<compile_context>
chip_gen: v7x
topology: tpu7x:2x2x1
jax: 0.10.0
libtpu: 0.0.40
codegen_flags: <defaults>
</compile_context>

<pallas_src>
import functools

import jax
import jax.numpy as jnp
from jax import lax
from jax.experimental import pallas as pl
from jax.experimental.pallas import tpu as pltpu


# ---------------------------------------------------------------------------- kernel


def selfattention_kernel(gamma_ref,      # SMEM (1, 1) f32
                         x_ref,          # VMEM (C, N) f32, N = block_b * W (lane-dense)
                         w_ref,          # VMEM (rows, C) bf16, rows = 2*C8p + C (fused Wq;Wk;Wv)
                         b_ref,          # VMEM (rows, 1) f32 (fused bq;bk;bv)
                         o_ref,          # VMEM (C, N) f32
                         *, width, c8p):
    gamma = gamma_ref[0, 0]

    x = x_ref[...]                                        # (C, N) f32 -- residual kept in f32
    n = x.shape[1]
    block_b = n // width                                  # static

    # Fused 1x1-conv projection: ONE (rows, C) x (C, N) bf16 matmul, f32 accumulation.
    qkv = jnp.dot(w_ref[...], x.astype(jnp.bfloat16),
                  preferred_element_type=jnp.float32) + b_ref[...]          # (rows, N)

    # Row slices at multiples of 8 sublanes (c8p is padded to a multiple of 8); the
    # zero-padded q/k rows contribute exactly 0 to the energy contraction below.
    q = qkv[:c8p, :]                                      # (C8p, N)
    k = qkv[c8p:2 * c8p, :]                               # (C8p, N)
    v = qkv[2 * c8p:, :]                                  # (C,   N)

    # energy[i, j] = sum_o q[o, i] * k[o, j]  == q^T k   (contract dim 0 of both operands)
    energy = lax.dot_general(q.astype(jnp.bfloat16), k.astype(jnp.bfloat16),
                             (((0,), (0,)), ((), ())),
                             preferred_element_type=jnp.float32)            # (N, N)

    if block_b > 1:
        # Block-diagonal mask: a query column only attends within its own batch element.
        # Batch ids are built with `>=` compare-and-count (block_b is small and static)
        # instead of vector integer division, which the VPU does not support.
        row_i = lax.broadcasted_iota(jnp.int32, (n, 1), 0)
        col_i = lax.broadcasted_iota(jnp.int32, (1, n), 1)
        rb = jnp.zeros((n, 1), jnp.int32)
        cb = jnp.zeros((1, n), jnp.int32)
        for m in range(1, block_b):
            rb = rb + (row_i >= m * width).astype(jnp.int32)
            cb = cb + (col_i >= m * width).astype(jnp.int32)
        energy = jnp.where(rb == cb, energy, jnp.float32(-1e30))

    # Numerically stable softmax over the key axis, all in f32 (VPU/EUP); denominator
    # via the approximate EUP reciprocal (separate issue slot -> effectively free).
    energy = energy - jnp.max(energy, axis=-1, keepdims=True)
    p = jnp.exp(energy)
    attn = p * pl.reciprocal(jnp.sum(p, axis=-1, keepdims=True), approx=True)

    # out[c, i] = sum_j v[c, j] * attn[i, j]  == v attn^T  (contract dim 1 of both)
    out = lax.dot_general(v.astype(jnp.bfloat16), attn.astype(jnp.bfloat16),
                          (((1,), (1,)), ((), ())),
                          preferred_element_type=jnp.float32)               # (C, N)

    # Lane-dense store of the whole slab.
    o_ref[...] = (gamma * out + x).astype(o_ref.dtype)


# ---------------------------------------------------------------------------- sizing


def _tpu_vmem_capacity_bytes():
    try:
        info = pltpu.get_tpu_info()
        cap = getattr(info, "vmem_capacity_bytes", None)
        if cap:
            return int(cap)
    except Exception:
        pass
    return 128 * 1024 * 1024                       # v5e / v6e default


def _vmem_limit_cap_bytes():
    """Generation-aware ceiling for vmem_limit_bytes."""
    cap = _tpu_vmem_capacity_bytes()
    if cap >= 96 * 1024 * 1024:                    # v5e / v6e: 128 MiB physical VMEM
        return int(0.80 * cap)                     # ~100 MiB, leave compiler-scratch headroom
    return min(48 * 1024 * 1024, int(0.75 * cap))  # v7x: 64 MiB physical VMEM


def _vmem_estimate_bytes(block_b, C, C8p, W):
    n = block_b * W
    rows = 2 * C8p + C
    io = 2 * 2 * C * n * 4                         # x-in + out panels, double-buffered f32
    wts = 2 * (rows * C * 2 + rows * 4)            # fused bf16 weights + f32 bias (worst case)
    interm = (rows * n + 3 * n * n + C * n) * 4    # qkv, energy/p/attn, out (f32)
    return io + wts + interm


def _choose_block_b(B, C, C8p, W, vmem_budget):
    # block_b must divide B and yield a 128-lane-aligned panel width (or cover all of B).
    candidates = [d for d in range(1, B + 1)
                  if B % d == 0 and (d == B or (d * W) % 128 == 0)]
    fitting = [d for d in candidates if _vmem_estimate_bytes(d, C, C8p, W) <= vmem_budget]
    if not fitting:
        # Nothing fits the budget: take the smallest-footprint candidate and let the
        # compiler try.  TODO(synk): flash-style key tiling is the real fix for huge W.
        return min(candidates, key=lambda d: _vmem_estimate_bytes(d, C, C8p, W))
    lane_dense = [d for d in fitting if d * W >= 128]
    if lane_dense:
        # Smallest lane-dense block: fills the 128-lane vregs/MXU without inflating the
        # (N, N) block-diagonal energy footprint, and keeps the grid (parallel batch
        # axis) as long as possible so v7x's two TensorCores both stay busy.
        return min(lane_dense)
    return max(fitting)


# ---------------------------------------------------------------------------- wrapper


def selfattention(x, wq, wk, wv, bq, bk, bv, gamma, *, block_b=None):
    """x: (B, C, W) f32.  wq/wk: (C//8, C), wv: (C, C), biases 1-D, gamma shape (1,)."""
    B, C, W = x.shape
    C8 = wq.shape[0]
    C8p = max(8, ((C8 + 7) // 8) * 8)              # pad q/k rows to a sublane multiple
    rows = 2 * C8p + C

    # ---- wrapper-side layout plumbing (cheap XLA ops) ----
    # Fused, zero-padded projection weights, pre-cast to bf16 (halves weight DMA bytes
    # and removes the per-grid-step cast).  Biases stay f32.
    wq_p = jnp.zeros((C8p, C), wq.dtype).at[:C8].set(wq)
    wk_p = jnp.zeros((C8p, C), wk.dtype).at[:C8].set(wk)
    bq_p = jnp.zeros((C8p,), jnp.float32).at[:C8].set(bq.astype(jnp.float32))
    bk_p = jnp.zeros((C8p,), jnp.float32).at[:C8].set(bk.astype(jnp.float32))
    w_fused = jnp.concatenate([wq_p, wk_p, wv], axis=0).astype(jnp.bfloat16)     # (rows, C)
    b_fused = jnp.concatenate([bq_p, bk_p, bv.astype(jnp.float32)],
                              axis=0).reshape(rows, 1)                            # (rows, 1)

    # Channel-major, lane-dense panel: column (b*W + w) holds x[b, :, w].
    x_panel = jnp.transpose(x, (1, 0, 2)).reshape(C, B * W)
    gamma2 = jnp.asarray(gamma, dtype=jnp.float32).reshape(1, 1)

    limit_cap = _vmem_limit_cap_bytes()
    if block_b is None:
        block_b = _choose_block_b(B, C, C8p, W, vmem_budget=int(0.6 * limit_cap))
    assert B % block_b == 0, (B, block_b)
    assert block_b == B or (block_b * W) % 128 == 0, (block_b, W)
    n = block_b * W
    grid = (B // block_b,)
    vmem_limit = int(min(limit_cap,
                         max(32 * 1024 * 1024,
                             2 * _vmem_estimate_bytes(block_b, C, C8p, W))))

    kern = functools.partial(selfattention_kernel, width=W, c8p=C8p)

    def build_and_run(single_buffer_consts):
        const_kw = dict(pipeline_mode=pl.Buffered(1)) if single_buffer_consts else {}
        grid_spec = pltpu.PrefetchScalarGridSpec(
            num_scalar_prefetch=0,
            grid=grid,
            in_specs=[
                pl.BlockSpec(memory_space=pltpu.MemorySpace.SMEM),       # gamma (1,1)
                pl.BlockSpec((C, n), lambda i: (0, i)),                  # x panel slab
                pl.BlockSpec((rows, C), lambda i: (0, 0), **const_kw),   # fused bf16 weights
                pl.BlockSpec((rows, 1), lambda i: (0, 0), **const_kw),   # fused f32 biases
            ],
            out_specs=pl.BlockSpec((C, n), lambda i: (0, i)),            # lane-dense output
        )
        return pl.pallas_call(
            kern,
            out_shape=jax.ShapeDtypeStruct((C, B * W), x.dtype),
            grid_spec=grid_spec,
            compiler_params=pltpu.CompilerParams(
                dimension_semantics=("parallel",),
                vmem_limit_bytes=vmem_limit,
            ),
        )(gamma2, x_panel, w_fused, b_fused)

    try:
        # Constant-index operands don't need double buffering.
        o_panel = build_and_run(True)
    except Exception:
        # pl.Buffered(1) unsupported on this jax build: fall back to default buffering
        # (tiny VMEM delta at these sizes).
        o_panel = build_and_run(False)

    return jnp.transpose(o_panel.reshape(C, B, W), (1, 0, 2))


# --------------------------------------------------------------------------- reference


def selfattention_ref(x, wq, wk, wv, bq, bk, bv, gamma):
    """Pure-JAX reference mirroring the PyTorch forward."""
    q = jnp.einsum('oc,bcw->bow', wq, x) + bq[None, :, None]   # (B, C8, W)
    k = jnp.einsum('oc,bcw->bow', wk, x) + bk[None, :, None]   # (B, C8, W)
    v = jnp.einsum('oc,bcw->bow', wv, x) + bv[None, :, None]   # (B, C,  W)
    energy = jnp.einsum('bcq,bck->bqk', q, k)                  # (B, W, W)
    attn = jax.nn.softmax(energy, axis=-1)
    out = jnp.einsum('bcw,bqw->bcq', v, attn)                  # (B, C, W)
    return gamma[0] * out + x


# ------------------------------------------------------------------------------- main


if __name__ == "__main__":
    def make_inputs(B, C, W, seed):
        C8 = max(1, C // 8)
        key = jax.random.PRNGKey(seed)
        kx, kq, kk, kv, kbq, kbk, kbv = jax.random.split(key, 7)
        x = jax.random.normal(kx, (B, C, W), dtype=jnp.float32)
        # Conv1d(kernel_size=1) weights: (out, in, 1) in torch -> squeezed to (out, in)
        wq = jax.random.normal(kq, (C8, C), dtype=jnp.float32) * 0.1
        wk = jax.random.normal(kk, (C8, C), dtype=jnp.float32) * 0.1
        wv = jax.random.normal(kv, (C, C), dtype=jnp.float32) * 0.1
        bq = jax.random.normal(kbq, (C8,), dtype=jnp.float32) * 0.1
        bk = jax.random.normal(kbk, (C8,), dtype=jnp.float32) * 0.1
        bv = jax.random.normal(kbv, (C,), dtype=jnp.float32) * 0.1
        return x, wq, wk, wv, bq, bk, bv

    # Case 1: W < 128 -> several batch elements packed into one lane-dense panel
    # (block-diagonal masked softmax path), grid of 2 parallel steps.
    x, wq, wk, wv, bq, bk, bv = make_inputs(16, 32, 16, seed=0)

    gamma0 = jnp.zeros((1,), dtype=jnp.float32)   # matches nn.Parameter(torch.zeros(1))
    y = jax.block_until_ready(selfattention(x, wq, wk, wv, bq, bk, bv, gamma0))
    y_ref = selfattention_ref(x, wq, wk, wv, bq, bk, bv, gamma0)
    assert jnp.allclose(y, y_ref, atol=1e-6, rtol=1e-6), "mismatch (gamma=0, W=16)"

    gamma1 = jnp.array([0.5], dtype=jnp.float32)
    y = jax.block_until_ready(selfattention(x, wq, wk, wv, bq, bk, bv, gamma1))
    y_ref = selfattention_ref(x, wq, wk, wv, bq, bk, bv, gamma1)
    # bf16 matmuls + approx reciprocal -> ~1e-3 relative error vs the pure-f32 reference.
    assert jnp.allclose(y, y_ref, atol=2e-2, rtol=2e-2), "mismatch (gamma=0.5, W=16)"

    # Case 2: W >= 128 -> block_b = 1 (no mask), grid of 4 parallel steps.
    x, wq, wk, wv, bq, bk, bv = make_inputs(4, 16, 128, seed=1)
    gamma2 = jnp.array([0.7], dtype=jnp.float32)
    y = jax.block_until_ready(selfattention(x, wq, wk, wv, bq, bk, bv, gamma2))
    y_ref = selfattention_ref(x, wq, wk, wv, bq, bk, bv, gamma2)
    assert jnp.allclose(y, y_ref, atol=2e-2, rtol=2e-2), "mismatch (gamma=0.7, W=128)"

    print("KERNEL_OK")
</pallas_src>

<mosaic_0001>
module attributes {stable_mosaic.version = 11 : i64} {
  func.func @selfattention_kernel(%arg0: i32, %arg1: memref<1x1xf32, #tpu.memory_space<smem>>, %arg2: memref<32x128xf32, #tpu.memory_space<vmem>>, %arg3: memref<48x32xbf16, #tpu.memory_space<vmem>>, %arg4: memref<48x1xf32, #tpu.memory_space<vmem>>, %arg5: memref<32x128xf32, #tpu.memory_space<vmem>>) attributes {dimension_semantics = [#tpu.dimension_semantics<parallel>], iteration_bounds = array<i64: 2>, scalar_prefetch = 0 : i64, scratch_operands = 0 : i64, tpu.core_type = #tpu.core_type<tc>, window_params = [{transform_indices = @transform_0, window_bounds = array<i64: 1, 1>}, {transform_indices = @transform_1, window_bounds = array<i64: 32, 128>}, {pipeline_mode = #tpu.pipeline_mode<synchronous>, transform_indices = @transform_2, window_bounds = array<i64: 48, 32>}, {pipeline_mode = #tpu.pipeline_mode<synchronous>, transform_indices = @transform_3, window_bounds = array<i64: 48, 1>}, {transform_indices = @transform_4, window_bounds = array<i64: 32, 128>}]} {
    %c0 = arith.constant 0 : index
    %c0_0 = arith.constant 0 : index
    %0 = memref.load %arg1[%c0, %c0_0] : memref<1x1xf32, #tpu.memory_space<smem>>
    %c0_1 = arith.constant 0 : index
    %c0_2 = arith.constant 0 : index
    %1 = vector.load %arg2[%c0_1, %c0_2] : memref<32x128xf32, #tpu.memory_space<vmem>>, vector<32x128xf32>
    %c0_3 = arith.constant 0 : index
    %c0_4 = arith.constant 0 : index
    %2 = vector.load %arg3[%c0_3, %c0_4] : memref<48x32xbf16, #tpu.memory_space<vmem>>, vector<48x32xbf16>
    %3 = arith.truncf %1 : vector<32x128xf32> to vector<32x128xbf16>
    %cst = arith.constant dense<0.000000e+00> : vector<48x128xf32>
    %4 = tpu.matmul %2, %3, %cst {dimension_numbers = #tpu.dot_dimension_numbers<[1], [0], [0], [1], [0, 0, 1, 1], [], []>} : vector<48x32xbf16>, vector<32x128xbf16>, vector<48x128xf32> -> vector<48x128xf32>
    %c0_5 = arith.constant 0 : index
    %c0_6 = arith.constant 0 : index
    %5 = vector.load %arg4[%c0_5, %c0_6] : memref<48x1xf32, #tpu.memory_space<vmem>>, vector<48x1xf32>
    %6 = vector.broadcast %5 : vector<48x1xf32> to vector<48x128xf32>
    %7 = arith.addf %4, %6 : vector<48x128xf32>
    %8 = vector.extract_strided_slice %7 {offsets = [0, 0], sizes = [8, 128], strides = [1, 1]} : vector<48x128xf32> to vector<8x128xf32>
    %9 = vector.extract_strided_slice %7 {offsets = [8, 0], sizes = [8, 128], strides = [1, 1]} : vector<48x128xf32> to vector<8x128xf32>
    %10 = vector.extract_strided_slice %7 {offsets = [16, 0], sizes = [32, 128], strides = [1, 1]} : vector<48x128xf32> to vector<32x128xf32>
    %11 = arith.truncf %8 : vector<8x128xf32> to vector<8x128xbf16>
    %12 = arith.truncf %9 : vector<8x128xf32> to vector<8x128xbf16>
    %cst_7 = arith.constant dense<0.000000e+00> : vector<128x128xf32>
    %13 = tpu.matmul %11, %12, %cst_7 {dimension_numbers = #tpu.dot_dimension_numbers<[0], [0], [1], [1], [0, 1, 1, 1], [], []>} : vector<8x128xbf16>, vector<8x128xbf16>, vector<128x128xf32> -> vector<128x128xf32>
    %14 = tpu.iota {dimensions = array<i32: 0>} : vector<128x1xi32>
    %15 = tpu.iota {dimensions = array<i32: 1>} : vector<1x128xi32>
    %c0_i32 = arith.constant 0 : i32
    %16 = vector.broadcast %c0_i32 : i32 to vector<128x1xi32>
    %c0_i32_8 = arith.constant 0 : i32
    %17 = vector.broadcast %c0_i32_8 : i32 to vector<1x128xi32>
    %c16_i32 = arith.constant 16 : i32
    %18 = vector.broadcast %c16_i32 : i32 to vector<128x1xi32>
    %19 = arith.cmpi sge, %14, %18 : vector<128x1xi32>
    %20 = arith.extui %19 : vector<128x1xi1> to vector<128x1xi32>
    %21 = arith.addi %16, %20 : vector<128x1xi32>
    %c16_i32_9 = arith.constant 16 : i32
    %22 = vector.broadcast %c16_i32_9 : i32 to vector<1x128xi32>
    %23 = arith.cmpi sge, %15, %22 : vector<1x128xi32>
    %24 = arith.extui %23 : vector<1x128xi1> to vector<1x128xi32>
    %25 = arith.addi %17, %24 : vector<1x128xi32>
    %c32_i32 = arith.constant 32 : i32
    %26 = vector.broadcast %c32_i32 : i32 to vector<128x1xi32>
    %27 = arith.cmpi sge, %14, %26 : vector<128x1xi32>
    %28 = arith.extui %27 : vector<128x1xi1> to vector<128x1xi32>
    %29 = arith.addi %21, %28 : vector<128x1xi32>
    %c32_i32_10 = arith.constant 32 : i32
    %30 = vector.broadcast %c32_i32_10 : i32 to vector<1x128xi32>
    %31 = arith.cmpi sge, %15, %30 : vector<1x128xi32>
    %32 = arith.extui %31 : vector<1x128xi1> to vector<1x128xi32>
    %33 = arith.addi %25, %32 : vector<1x128xi32>
    %c48_i32 = arith.constant 48 : i32
    %34 = vector.broadcast %c48_i32 : i32 to vector<128x1xi32>
    %35 = arith.cmpi sge, %14, %34 : vector<128x1xi32>
    %36 = arith.extui %35 : vector<128x1xi1> to vector<128x1xi32>
    %37 = arith.addi %29, %36 : vector<128x1xi32>
    %c48_i32_11 = arith.constant 48 : i32
    %38 = vector.broadcast %c48_i32_11 : i32 to vector<1x128xi32>
    %39 = arith.cmpi sge, %15, %38 : vector<1x128xi32>
    %40 = arith.extui %39 : vector<1x128xi1> to vector<1x128xi32>
    %41 = arith.addi %33, %40 : vector<1x128xi32>
    %c64_i32 = arith.constant 64 : i32
    %42 = vector.broadcast %c64_i32 : i32 to vector<128x1xi32>
    %43 = arith.cmpi sge, %14, %42 : vector<128x1xi32>
    %44 = arith.extui %43 : vector<128x1xi1> to vector<128x1xi32>
    %45 = arith.addi %37, %44 : vector<128x1xi32>
    %c64_i32_12 = arith.constant 64 : i32
    %46 = vector.broadcast %c64_i32_12 : i32 to vector<1x128xi32>
    %47 = arith.cmpi sge, %15, %46 : vector<1x128xi32>
    %48 = arith.extui %47 : vector<1x128xi1> to vector<1x128xi32>
    %49 = arith.addi %41, %48 : vector<1x128xi32>
    %c80_i32 = arith.constant 80 : i32
    %50 = vector.broadcast %c80_i32 : i32 to vector<128x1xi32>
    %51 = arith.cmpi sge, %14, %50 : vector<128x1xi32>
    %52 = arith.extui %51 : vector<128x1xi1> to vector<128x1xi32>
    %53 = arith.addi %45, %52 : vector<128x1xi32>
    %c80_i32_13 = arith.constant 80 : i32
    %54 = vector.broadcast %c80_i32_13 : i32 to vector<1x128xi32>
    %55 = arith.cmpi sge, %15, %54 : vector<1x128xi32>
    %56 = arith.extui %55 : vector<1x128xi1> to vector<1x128xi32>
    %57 = arith.addi %49, %56 : vector<1x128xi32>
    %c96_i32 = arith.constant 96 : i32
    %58 = vector.broadcast %c96_i32 : i32 to vector<128x1xi32>
    %59 = arith.cmpi sge, %14, %58 : vector<128x1xi32>
    %60 = arith.extui %59 : vector<128x1xi1> to vector<128x1xi32>
    %61 = arith.addi %53, %60 : vector<128x1xi32>
    %c96_i32_14 = arith.constant 96 : i32
    %62 = vector.broadcast %c96_i32_14 : i32 to vector<1x128xi32>
    %63 = arith.cmpi sge, %15, %62 : vector<1x128xi32>
    %64 = arith.extui %63 : vector<1x128xi1> to vector<1x128xi32>
    %65 = arith.addi %57, %64 : vector<1x128xi32>
    %c112_i32 = arith.constant 112 : i32
    %66 = vector.broadcast %c112_i32 : i32 to vector<128x1xi32>
    %67 = arith.cmpi sge, %14, %66 : vector<128x1xi32>
    %68 = arith.extui %67 : vector<128x1xi1> to vector<128x1xi32>
    %69 = arith.addi %61, %68 : vector<128x1xi32>
    %c112_i32_15 = arith.constant 112 : i32
    %70 = vector.broadcast %c112_i32_15 : i32 to vector<1x128xi32>
    %71 = arith.cmpi sge, %15, %70 : vector<1x128xi32>
    %72 = arith.extui %71 : vector<1x128xi1> to vector<1x128xi32>
    %73 = arith.addi %65, %72 : vector<1x128xi32>
    %74 = vector.broadcast %69 : vector<128x1xi32> to vector<128x128xi32>
    %75 = vector.broadcast %73 : vector<1x128xi32> to vector<128x128xi32>
    %76 = arith.cmpi eq, %74, %75 : vector<128x128xi32>
    %cst_16 = arith.constant -1.000000e+30 : f32
    %77 = vector.broadcast %cst_16 : f32 to vector<128x128xf32>
    %78 = arith.select %76, %13, %77 : vector<128x128xi1>, vector<128x128xf32>
    %cst_17 = arith.constant dense<0xFF800000> : vector<128xf32>
    %79 = vector.multi_reduction <maximumf>, %78, %cst_17 [1] : vector<128x128xf32> to vector<128xf32>
    %80 = vector.shape_cast %79 : vector<128xf32> to vector<128x1xf32>
    %81 = vector.broadcast %80 : vector<128x1xf32> to vector<128x128xf32>
    %82 = arith.subf %78, %81 : vector<128x128xf32>
    %83 = math.exp %82 : vector<128x128xf32>
    %cst_18 = arith.constant dense<0.000000e+00> : vector<128xf32>
    %84 = vector.multi_reduction <add>, %83, %cst_18 [1] : vector<128x128xf32> to vector<128xf32>
    %85 = vector.shape_cast %84 : vector<128xf32> to vector<128x1xf32>
    %86 = tpu.reciprocal %85 {approx = true} : vector<128x1xf32> -> vector<128x1xf32>
    %87 = vector.broadcast %86 : vector<128x1xf32> to vector<128x128xf32>
    %88 = arith.mulf %83, %87 : vector<128x128xf32>
    %89 = arith.truncf %10 : vector<32x128xf32> to vector<32x128xbf16>
    %90 = arith.truncf %88 : vector<128x128xf32> to vector<128x128xbf16>
    %cst_19 = arith.constant dense<0.000000e+00> : vector<32x128xf32>
    %91 = tpu.matmul %89, %90, %cst_19 {dimension_numbers = #tpu.dot_dimension_numbers<[1], [1], [0], [0], [0, 0, 1, 0], [], []>} : vector<32x128xbf16>, vector<128x128xbf16>, vector<32x128xf32> -> vector<32x128xf32>
    %92 = vector.broadcast %0 : f32 to vector<32x128xf32>
    %93 = arith.mulf %92, %91 : vector<32x128xf32>
    %94 = arith.addf %93, %1 : vector<32x128xf32>
    %c0_20 = arith.constant 0 : index
    %c0_21 = arith.constant 0 : index
    %95 = vector.load %arg5[%c0_20, %c0_21] : memref<32x128xf32, #tpu.memory_space<vmem>>, vector<32x128xf32>
    tpu.vector_store %arg5[%c0_20, %c0_21], %94 {strides = array<i32>} : memref<32x128xf32, #tpu.memory_space<vmem>>, vector<32x128xf32>,
    return
  }
  func.func @transform_0(%arg0: i32) -> (i32, i32) {
    %c0_i32 = arith.constant 0 : i32
    %c0_i32_0 = arith.constant 0 : i32
    %c0_i32_1 = arith.constant 0 : i32
    return %c0_i32, %c0_i32_0 : i32, i32
  }
  func.func @transform_1(%arg0: i32) -> (i32, i32) {
    %c0_i32 = arith.constant 0 : i32
    %c0_i32_0 = arith.constant 0 : i32
    return %c0_i32, %arg0 : i32, i32
  }
  func.func @transform_2(%arg0: i32) -> (i32, i32) {
    %c0_i32 = arith.constant 0 : i32
    %c0_i32_0 = arith.constant 0 : i32
    %c0_i32_1 = arith.constant 0 : i32
    return %c0_i32, %c0_i32_0 : i32, i32
  }
  func.func @transform_3(%arg0: i32) -> (i32, i32) {
    %c0_i32 = arith.constant 0 : i32
    %c0_i32_0 = arith.constant 0 : i32
    %c0_i32_1 = arith.constant 0 : i32
    return %c0_i32, %c0_i32_0 : i32, i32
  }
  func.func @transform_4(%arg0: i32) -> (i32, i32) {
    %c0_i32 = arith.constant 0 : i32
    %c0_i32_0 = arith.constant 0 : i32
    return %c0_i32, %arg0 : i32, i32
  }
}

module attributes {stable_mosaic.version = 11 : i64} {
  func.func @selfattention_kernel(%arg0: i32, %arg1: memref<1x1xf32, #tpu.memory_space<smem>>, %arg2: memref<32x128xf32, #tpu.memory_space<vmem>>, %arg3: memref<48x32xbf16, #tpu.memory_space<vmem>>, %arg4: memref<48x1xf32, #tpu.memory_space<vmem>>, %arg5: memref<32x128xf32, #tpu.memory_space<vmem>>) attributes {dimension_semantics = [#tpu.dimension_semantics<parallel>], iteration_bounds = array<i64: 2>, scalar_prefetch = 0 : i64, scratch_operands = 0 : i64, tpu.core_type = #tpu.core_type<tc>, window_params = [{transform_indices = @transform_0, window_bounds = array<i64: 1, 1>}, {transform_indices = @transform_1, window_bounds = array<i64: 32, 128>}, {pipeline_mode = #tpu.pipeline_mode<synchronous>, transform_indices = @transform_2, window_bounds = array<i64: 48, 32>}, {pipeline_mode = #tpu.pipeline_mode<synchronous>, transform_indices = @transform_3, window_bounds = array<i64: 48, 1>}, {transform_indices = @transform_4, window_bounds = array<i64: 32, 128>}]} {
    %c0 = arith.constant 0 : index
    %c0_0 = arith.constant 0 : index
    %0 = memref.load %arg1[%c0, %c0_0] : memref<1x1xf32, #tpu.memory_space<smem>>
    %c0_1 = arith.constant 0 : index
    %c0_2 = arith.constant 0 : index
    %1 = vector.load %arg2[%c0_1, %c0_2] : memref<32x128xf32, #tpu.memory_space<vmem>>, vector<32x128xf32>
    %c0_3 = arith.constant 0 : index
    %c0_4 = arith.constant 0 : index
    %2 = vector.load %arg3[%c0_3, %c0_4] : memref<48x32xbf16, #tpu.memory_space<vmem>>, vector<48x32xbf16>
    %3 = arith.truncf %1 : vector<32x128xf32> to vector<32x128xbf16>
    %cst = arith.constant dense<0.000000e+00> : vector<48x128xf32>
    %4 = tpu.matmul %2, %3, %cst {dimension_numbers = #tpu.dot_dimension_numbers<[1], [0], [0], [1], [0, 0, 1, 1], [], []>} : vector<48x32xbf16>, vector<32x128xbf16>, vector<48x128xf32> -> vector<48x128xf32>
    %c0_5 = arith.constant 0 : index
    %c0_6 = arith.constant 0 : index
    %5 = vector.load %arg4[%c0_5, %c0_6] : memref<48x1xf32, #tpu.memory_space<vmem>>, vector<48x1xf32>
    %6 = vector.broadcast %5 : vector<48x1xf32> to vector<48x128xf32>
    %7 = arith.addf %4, %6 : vector<48x128xf32>
    %8 = vector.extract_strided_slice %7 {offsets = [0, 0], sizes = [8, 128], strides = [1, 1]} : vector<48x128xf32> to vector<8x128xf32>
    %9 = vector.extract_strided_slice %7 {offsets = [8, 0], sizes = [8, 128], strides = [1, 1]} : vector<48x128xf32> to vector<8x128xf32>
    %10 = vector.extract_strided_slice %7 {offsets = [16, 0], sizes = [32, 128], strides = [1, 1]} : vector<48x128xf32> to vector<32x128xf32>
    %11 = arith.truncf %8 : vector<8x128xf32> to vector<8x128xbf16>
    %12 = arith.truncf %9 : vector<8x128xf32> to vector<8x128xbf16>
    %cst_7 = arith.constant dense<0.000000e+00> : vector<128x128xf32>
    %13 = tpu.matmul %11, %12, %cst_7 {dimension_numbers = #tpu.dot_dimension_numbers<[0], [0], [1], [1], [0, 1, 1, 1], [], []>} : vector<8x128xbf16>, vector<8x128xbf16>, vector<128x128xf32> -> vector<128x128xf32>
    %14 = tpu.iota {dimensions = array<i32: 0>} : vector<128x1xi32>
    %15 = tpu.iota {dimensions = array<i32: 1>} : vector<1x128xi32>
    %c0_i32 = arith.constant 0 : i32
    %16 = vector.broadcast %c0_i32 : i32 to vector<128x1xi32>
    %c0_i32_8 = arith.constant 0 : i32
    %17 = vector.broadcast %c0_i32_8 : i32 to vector<1x128xi32>
    %c16_i32 = arith.constant 16 : i32
    %18 = vector.broadcast %c16_i32 : i32 to vector<128x1xi32>
    %19 = arith.cmpi sge, %14, %18 : vector<128x1xi32>
    %20 = arith.extui %19 : vector<128x1xi1> to vector<128x1xi32>
    %21 = arith.addi %16, %20 : vector<128x1xi32>
    %c16_i32_9 = arith.constant 16 : i32
    %22 = vector.broadcast %c16_i32_9 : i32 to vector<1x128xi32>
    %23 = arith.cmpi sge, %15, %22 : vector<1x128xi32>
    %24 = arith.extui %23 : vector<1x128xi1> to vector<1x128xi32>
    %25 = arith.addi %17, %24 : vector<1x128xi32>
    %c32_i32 = arith.constant 32 : i32
    %26 = vector.broadcast %c32_i32 : i32 to vector<128x1xi32>
    %27 = arith.cmpi sge, %14, %26 : vector<128x1xi32>
    %28 = arith.extui %27 : vector<128x1xi1> to vector<128x1xi32>
    %29 = arith.addi %21, %28 : vector<128x1xi32>
    %c32_i32_10 = arith.constant 32 : i32
    %30 = vector.broadcast %c32_i32_10 : i32 to vector<1x128xi32>
    %31 = arith.cmpi sge, %15, %30 : vector<1x128xi32>
    %32 = arith.extui %31 : vector<1x128xi1> to vector<1x128xi32>
    %33 = arith.addi %25, %32 : vector<1x128xi32>
    %c48_i32 = arith.constant 48 : i32
    %34 = vector.broadcast %c48_i32 : i32 to vector<128x1xi32>
    %35 = arith.cmpi sge, %14, %34 : vector<128x1xi32>
    %36 = arith.extui %35 : vector<128x1xi1> to vector<128x1xi32>
    %37 = arith.addi %29, %36 : vector<128x1xi32>
    %c48_i32_11 = arith.constant 48 : i32
    %38 = vector.broadcast %c48_i32_11 : i32 to vector<1x128xi32>
    %39 = arith.cmpi sge, %15, %38 : vector<1x128xi32>
    %40 = arith.extui %39 : vector<1x128xi1> to vector<1x128xi32>
    %41 = arith.addi %33, %40 : vector<1x128xi32>
    %c64_i32 = arith.constant 64 : i32
    %42 = vector.broadcast %c64_i32 : i32 to vector<128x1xi32>
    %43 = arith.cmpi sge, %14, %42 : vector<128x1xi32>
    %44 = arith.extui %43 : vector<128x1xi1> to vector<128x1xi32>
    %45 = arith.addi %37, %44 : vector<128x1xi32>
    %c64_i32_12 = arith.constant 64 : i32
    %46 = vector.broadcast %c64_i32_12 : i32 to vector<1x128xi32>
    %47 = arith.cmpi sge, %15, %46 : vector<1x128xi32>
    %48 = arith.extui %47 : vector<1x128xi1> to vector<1x128xi32>
    %49 = arith.addi %41, %48 : vector<1x128xi32>
    %c80_i32 = arith.constant 80 : i32
    %50 = vector.broadcast %c80_i32 : i32 to vector<128x1xi32>
    %51 = arith.cmpi sge, %14, %50 : vector<128x1xi32>
    %52 = arith.extui %51 : vector<128x1xi1> to vector<128x1xi32>
    %53 = arith.addi %45, %52 : vector<128x1xi32>
    %c80_i32_13 = arith.constant 80 : i32
    %54 = vector.broadcast %c80_i32_13 : i32 to vector<1x128xi32>
    %55 = arith.cmpi sge, %15, %54 : vector<1x128xi32>
    %56 = arith.extui %55 : vector<1x128xi1> to vector<1x128xi32>
    %57 = arith.addi %49, %56 : vector<1x128xi32>
    %c96_i32 = arith.constant 96 : i32
    %58 = vector.broadcast %c96_i32 : i32 to vector<128x1xi32>
    %59 = arith.cmpi sge, %14, %58 : vector<128x1xi32>
    %60 = arith.extui %59 : vector<128x1xi1> to vector<128x1xi32>
    %61 = arith.addi %53, %60 : vector<128x1xi32>
    %c96_i32_14 = arith.constant 96 : i32
    %62 = vector.broadcast %c96_i32_14 : i32 to vector<1x128xi32>
    %63 = arith.cmpi sge, %15, %62 : vector<1x128xi32>
    %64 = arith.extui %63 : vector<1x128xi1> to vector<1x128xi32>
    %65 = arith.addi %57, %64 : vector<1x128xi32>
    %c112_i32 = arith.constant 112 : i32
    %66 = vector.broadcast %c112_i32 : i32 to vector<128x1xi32>
    %67 = arith.cmpi sge, %14, %66 : vector<128x1xi32>
    %68 = arith.extui %67 : vector<128x1xi1> to vector<128x1xi32>
    %69 = arith.addi %61, %68 : vector<128x1xi32>
    %c112_i32_15 = arith.constant 112 : i32
    %70 = vector.broadcast %c112_i32_15 : i32 to vector<1x128xi32>
    %71 = arith.cmpi sge, %15, %70 : vector<1x128xi32>
    %72 = arith.extui %71 : vector<1x128xi1> to vector<1x128xi32>
    %73 = arith.addi %65, %72 : vector<1x128xi32>
    %74 = vector.broadcast %69 : vector<128x1xi32> to vector<128x128xi32>
    %75 = vector.broadcast %73 : vector<1x128xi32> to vector<128x128xi32>
    %76 = arith.cmpi eq, %74, %75 : vector<128x128xi32>
    %cst_16 = arith.constant -1.000000e+30 : f32
    %77 = vector.broadcast %cst_16 : f32 to vector<128x128xf32>
    %78 = arith.select %76, %13, %77 : vector<128x128xi1>, vector<128x128xf32>
    %cst_17 = arith.constant dense<0xFF800000> : vector<128xf32>
    %79 = vector.multi_reduction <maximumf>, %78, %cst_17 [1] : vector<128x128xf32> to vector<128xf32>
    %80 = vector.shape_cast %79 : vector<128xf32> to vector<128x1xf32>
    %81 = vector.broadcast %80 : vector<128x1xf32> to vector<128x128xf32>
    %82 = arith.subf %78, %81 : vector<128x128xf32>
    %83 = math.exp %82 : vector<128x128xf32>
    %cst_18 = arith.constant dense<0.000000e+00> : vector<128xf32>
    %84 = vector.multi_reduction <add>, %83, %cst_18 [1] : vector<128x128xf32> to vector<128xf32>
    %85 = vector.shape_cast %84 : vector<128xf32> to vector<128x1xf32>
    %86 = tpu.reciprocal %85 {approx = true} : vector<128x1xf32> -> vector<128x1xf32>
    %87 = vector.broadcast %86 : vector<128x1xf32> to vector<128x128xf32>
    %88 = arith.mulf %83, %87 : vector<128x128xf32>
    %89 = arith.truncf %10 : vector<32x128xf32> to vector<32x128xbf16>
    %90 = arith.truncf %88 : vector<128x128xf32> to vector<128x128xbf16>
    %cst_19 = arith.constant dense<0.000000e+00> : vector<32x128xf32>
    %91 = tpu.matmul %89, %90, %cst_19 {dimension_numbers = #tpu.dot_dimension_numbers<[1], [1], [0], [0], [0, 0, 1, 0], [], []>} : vector<32x128xbf16>, vector<128x128xbf16>, vector<32x128xf32> -> vector<32x128xf32>
    %92 = vector.broadcast %0 : f32 to vector<32x128xf32>
    %93 = arith.mulf %92, %91 : vector<32x128xf32>
    %94 = arith.addf %93, %1 : vector<32x128xf32>
    %c0_20 = arith.constant 0 : index
    %c0_21 = arith.constant 0 : index
    %95 = vector.load %arg5[%c0_20, %c0_21] : memref<32x128xf32, #tpu.memory_space<vmem>>, vector<32x128xf32>
    tpu.vector_store %arg5[%c0_20, %c0_21], %94 {strides = array<i32>} : memref<32x128xf32, #tpu.memory_space<vmem>>, vector<32x128xf32>,
    return
  }
  func.func @transform_0(%arg0: i32) -> (i32, i32) {
    %c0_i32 = arith.constant 0 : i32
    %c0_i32_0 = arith.constant 0 : i32
    %c0_i32_1 = arith.constant 0 : i32
    return %c0_i32, %c0_i32_0 : i32, i32
  }
  func.func @transform_1(%arg0: i32) -> (i32, i32) {
    %c0_i32 = arith.constant 0 : i32
    %c0_i32_0 = arith.constant 0 : i32
    return %c0_i32, %arg0 : i32, i32
  }
  func.func @transform_2(%arg0: i32) -> (i32, i32) {
    %c0_i32 = arith.constant 0 : i32
    %c0_i32_0 = arith.constant 0 : i32
    %c0_i32_1 = arith.constant 0 : i32
    return %c0_i32, %c0_i32_0 : i32, i32
  }
  func.func @transform_3(%arg0: i32) -> (i32, i32) {
    %c0_i32 = arith.constant 0 : i32
    %c0_i32_0 = arith.constant 0 : i32
    %c0_i32_1 = arith.constant 0 : i32
    return %c0_i32, %c0_i32_0 : i32, i32
  }
  func.func @transform_4(%arg0: i32) -> (i32, i32) {
    %c0_i32 = arith.constant 0 : i32
    %c0_i32_0 = arith.constant 0 : i32
    return %c0_i32, %arg0 : i32, i32
  }
}

</mosaic_0001>

<bundles_post_ra>
// kernel: tpu_custom_call.1
= control target key start
LH: loop header
LB: loop body
LE: loop exit
PB: predicated region body
PF: predicated region fallthrough
CT: control target
= control target key end

     0   :  { %s1828_s0 = inlined_call_operand.<no memory space> [shape: f32[1,1], index: 0, kind: input, shape index: {}]   ;;  %s1829_s1 = inlined_call_operand.vmem [shape: f32[32,256], index: 1, kind: input, shape index: {}]   ;;  %s1830_s2 = inlined_call_operand.vmem [shape: bf16[48,32], index: 2, kind: input, shape index: {}]   ;;  %s1831_s3 = inlined_call_operand.vmem [shape: f32[48,1], index: 3, kind: input, shape index: {}]   ;;  %s1832_s4 = inlined_call_operand.hbm [shape: f32[32,256], index: 4, kind: output, shape index: {}]  }
   0x1   :  { %9 = sst [smem:[#allocation2]] %s1828_s0 }
   0x2   :  { %10 = vsyncpa [#allocation5], 0 }
   0x3   :  { %12 = vsyncpa [#allocation5 + $0x1], 0  ;;  %s1541_s17 = smov 0   ;;  %s1543_s18 = smov 0  }
   0x4   :  { %s1545_s19 = smov 0   ;;  %s1547_s20 = smov 0  }
   0x5 LB: > { %s1206_s0 = sadd.s32 4294967295, %s1504_s20   ;;  %s1207_s21 = sadd.s32 4294967294, %s1504_s20   ;;  %s1504_s20 = sphi %s1547_s20, %s1838_s20   ;;  %s1500_s19 = sphi %s1545_s19, %s1837_s19   ;;  %s1496_s18 = sphi %s1543_s18, %s1836_s18   ;;  %s1492_s17 = sphi %s1541_s17, %s1835_s17  }
   0x6   : > { %s1564_s22 = sadd.s32 1, %s1504_s20   ;;  %s46_s23 = sadd.s32 1, %s1500_s19 }
   0x7   : > { %s43_s24 = ssub.s32 %s1504_s20, %s1564_s22  ;;  %p53_p0 = scmp.ne.s32.totalorder %s1500_s19, %s1496_s18 }
   0x8   : > { %p44_p1 = scmp.eq.s32.totalorder %s43_s24, 0  ;;  %p54_p2 = scmp.eq.s32.totalorder %s1504_s20, 0 }
   0x9   : > { %p125_p3 = scmp.eq.s32.totalorder %s1206_s0, 1  ;;  %p130_p4 = scmp.ne.s32.totalorder %s1496_s18, %s1492_s17 }
   0xa   : > { %s1577_s25 = scalar_select %p44_p1, %s1500_s19, %s46_s23  }
   0xb   : > { %p55_p5 = por %p54_p2, %p53_p0  ;;  %p1579_p6 = por %p125_p3, %p53_p0 }
   0xc   : > { %p131_p7 = scmp.eq.s32.totalorder %s1207_s21, 1  ;;  %p1209_p9 = scmp.ge.s32.totalorder %s1504_s20, 2 }
   0xe   : > { %p1583_p8 = por %p131_p7, %p130_p4  ;;  %156 = sbr.rel (%p1209_p9) target bundleno = 28 (0x1c), region = 28 }
  0x15   : > { %159 = sbr.rel (!%p55_p5) target bundleno = 28 (0x1c), region = 32  ;;  %s161_s28 = sand.u32 (%p55_p5), 1, %s1500_s19  }
  0x16   : > { %s1211_s29 = sshll.u32 (%p55_p5), %s1504_s20, 3  ;;  %s1210_s30 = sshll.u32 (%p55_p5), %s161_s28, 5 }
  0x17   : > { %s165_s7 = scalar_lea.vmem (%p55_p5), %s1829_s1, %s1211_s29  ;;  %s163_s8 = scalar_lea.vmem (%p55_p5), [#allocation3], %s1210_s30 }
  0x18   : > { %v199_v0 = vld [vmem:[%s165_s7] sm:$0xff] (%p55_p5)  ;;  %v201_v1 = vld [vmem:[%s165_s7 + $0x10] sm:$0xff] (%p55_p5) }
  0x19   : > { %v203_v2 = vld [vmem:[%s165_s7 + $0x20] sm:$0xff] (%p55_p5)  ;;  %200 = vst [vmem:[%s163_s8] sm:$0xff] (%p55_p5), %v199_v0  ;;  %202 = vst [vmem:[%s163_s8 + $0x8] sm:$0xff] (%p55_p5), %v201_v1  ;;  %v205_v3 = vld [vmem:[%s165_s7 + $0x30] sm:$0xff] (%p55_p5) }
  0x1a   : > { %204 = vst [vmem:[%s163_s8 + $0x10] sm:$0xff] (%p55_p5), %v203_v2  ;;  %206 = vst [vmem:[%s163_s8 + $0x18] sm:$0xff] (%p55_p5), %v205_v3 }
  0x1c PF: > { %p1212_p10 = scmp.ge.s32.totalorder %s1504_s20, 1  ;;  %p211_p11 = scmp.lt.s32.totalorder %s1504_s20, 3 }
  0x1e   : > { %p212_p12 = pnand %p1212_p10, %p211_p11 }
  0x1f   : > { %s218_s9 = sand.u32 (!%p212_p12), 1, %s1496_s18   ;;  %v1506_v4 = vmov (!%p212_p12), 0.0   ;;  %vm1507_vm0 = vmmov (!%p212_p12), 0   ;;  %v1508_v5 = vmov (!%p212_p12), 0   ;;  %v257_v6 = vld [vmem:[%s1831_s3] sm:$0xff] (!%p212_p12)  ;;  %v258_v12 = vld [vmem:[%s1831_s3 + $0x8] sm:$0xff] (!%p212_p12)  ;;  %v536_v44 = vlaneseq (!%p212_p12) }
  0x20   : > { %215 = sbr.rel (%p212_p12) target bundleno = 1196 (0x4ac), region = 70  ;;  %1273 = vmatprep.subr.bf16.mxu0 (!%p212_p12), %v1506_v4  ;;  %s1600_s10 = sshll.u32 (!%p212_p12), %s218_s9, 5  ;;  %1277 = vmatprep.mubr.msk.bf16.mxu0 (!%p212_p12), %vm1507_vm0, %v1506_v4  ;;  %v1375_v14 = vld [vmem:[%s1830_s2] sm:$0xff] (!%p212_p12)   ;;  %vm308_vm1 = vcmask (!%p212_p12), 261120   ;;  %v1376_v15 = vld [vmem:[%s1830_s2 + $0x8] sm:$0xff] (!%p212_p12)   ;;  %v1377_v16 = vld [vmem:[%s1830_s2 + $0x10] sm:$0xff] (!%p212_p12)  }
  0x21   : > { %1373 = vset.pattern.permute.xlu0 (!%p212_p12), %v1508_v5  ;;  %s220_s13 = scalar_lea.vmem (!%p212_p12), [#allocation3], %s1600_s10  ;;  %vm418_vm2 = vcmask (!%p212_p12), 1043456   ;;  %vm393_vm3 = vcmask (!%p212_p12), 64512   ;;  %v537_v45 = vand.u32 (!%p212_p12), 127, %v536_v44  ;;  %s244_s14 = sld [smem:[#allocation2]] (!%p212_p12) }
  0x22   : > { %v1608_v7 = vld [vmem:[%s220_s13] sm:$0xff] (!%p212_p12)  ;;  %v1610_v8 = vld [vmem:[%s220_s13 + $0x8] sm:$0xff] (!%p212_p12)  ;;  %v1612_v9 = vld [vmem:[%s220_s13 + $0x10] sm:$0xff] (!%p212_p12)  ;;  %265 = vperm.xlu0 (!%p212_p12), %1373, %v257_v6   ;;  %s242_s15 = scalar_lea.vmem (!%p212_p12), [#allocation4], %s1600_s10  ;;  %s1246_s21 = sshll.u32 (!%p212_p12), %s1206_s0, 7 }
  0x23   : > { %v255_v10 = vpack.c.bf16 (!%p212_p12), %v1610_v8, %v1608_v7  ;;  %v1616_v11 = vld [vmem:[%s220_s13 + $0x18] sm:$0xff] (!%p212_p12)  ;;  %vm570_vm4 = vcmp.ge.s32.totalorder (!%p212_p12), %v537_v45, 16  ;;  %vm620_vm5 = vcmp.ge.s32.totalorder (!%p212_p12), %v537_v45, 32  ;;  %vm671_vm6 = vcmp.ge.s32.totalorder (!%p212_p12), %v537_v45, 48  ;;  %s1139_s16 = sshll.u32 (!%p212_p12), %s242_s15, 4  ;;  %s1781_s0 = scalar_lea.hbm (!%p212_p12), %s1832_s4, %s1246_s21  ;;  %s1774_s16 = int_to_ptr.vmem [resolvable:$true] %s1139_s16 }
  0x24   : > { %v256_v13 = vpack.c.bf16 (!%p212_p12), %v1616_v11, %v1612_v9  ;;  %v571_v46 = vsel (!%p212_p12), %vm570_vm4, 1, %v1508_v5  ;;  %v621_v47 = vsel (!%p212_p12), %vm620_vm5, 1, %v1508_v5  ;;  %v672_v49 = vsel (!%p212_p12), %vm671_vm6, 1, %v1508_v5  ;;  %s1786_s24 = scalar_lea.sflag (!%p212_p12), [#allocation5], %s218_s9  ;;  %s1442_s28 = scalar_lea.vmem (!%p212_p12), %s1774_s16, 512 }
  0x25   : > { %1274 = vmatpush3.bf16.msra.mxu0 (!%p212_p12), %v255_v10  ;;  %v622_v48 = vadd.s32 (!%p212_p12), %v621_v47, %v571_v46  ;;  %vm722_vm7 = vcmp.ge.s32.totalorder (!%p212_p12), %v537_v45, 64  ;;  %vm773_vm8 = vcmp.ge.s32.totalorder (!%p212_p12), %v537_v45, 80  ;;  %vm824_vm9 = vcmp.ge.s32.totalorder (!%p212_p12), %v537_v45, 96  ;;  %p1443_p13 = scmp.ne.s32.totalorder (!%p212_p12), %s1774_s16, %s1442_s28  ;;  %s1509_s29 = smov (!%p212_p12), [#allocation4]  }
  0x26   : > { %1275 = vmatprep.subr.bf16.mxu0 (!%p212_p12), %v1506_v4  ;;  %270 = vperm.xlu0 (!%p212_p12), %1373, %v258_v12   ;;  %v723_v51 = vsel (!%p212_p12), %vm722_vm7, 1, %v1508_v5  ;;  %v774_v53 = vsel (!%p212_p12), %vm773_vm8, 1, %v1508_v5  ;;  %v825_v55 = vsel (!%p212_p12), %vm824_vm9, 1, %v1508_v5  ;;  %vm875_vm10 = vcmp.ge.s32.totalorder (!%p212_p12), %v537_v45, 112  ;;  %s1446_s30 = sshll.u32 (!%p212_p12), %s1509_s29, 4  ;;  %s1447_s30 = int_to_ptr.vmem [resolvable:$false] %s1446_s30 }
  0x27   : > { %v673_v50 = vadd.s32 %v672_v49, %v622_v48  ;;  %v876_v57 = vsel %vm875_vm10, 1, %v1508_v5  ;;  %p1444_p0 = pnand %p1443_p13, %p1579_p6  ;;  %s1448_s5 = scalar_lea.vmem %s1447_s30, 1024 }
  0x28   : > { %p1449_p2 = scmp.lt.s32.totalorder %s1774_s16, %s1447_s30  ;;  %p1450_p3 = scmp.lt.s32.totalorder %s1448_s5, %s1442_s28 }
  0x29   : > { %1276 = vmatpush3.bf16.msra.mxu0 %v256_v13  ;;  %v724_v52 = vadd.s32 %v723_v51, %v673_v50  ;;  %p1445_p1 = pneg %p1444_p0 }
  0x2a   : > { %p1451_p4 = por %p1450_p3, %p1449_p2 }
  0x2b   : > { %v775_v54 = vadd.s32 %v774_v53, %v724_v52 }
  0x2c   : > { %1278 = vmatmul.mubr.msk.bf16.vlgmr.msra.gmra.mrb[0].mxu0 %vm308_vm1, %v1375_v14  ;;  %p1452_p5 = pnand %p1451_p4, %p1445_p1 }
  0x2d   : > { %1281 = vmatprep.mubr.msk.bf16.mxu0 %vm1507_vm0, %v1506_v4  ;;  %v826_v56 = vadd.s32 %v825_v55, %v775_v54 }
  0x2f   : > { %v877_v58 = vadd.s32 %v876_v57, %v826_v56 }
  0x31   : > { %vm1229_vm11 = vcmp.eq.s32.totalorder %v877_v58, 0  ;;  %vm1231_vm12 = vcmp.eq.s32.totalorder %v877_v58, 1  ;;  %vm1233_vm13 = vcmp.eq.s32.totalorder %v877_v58, 2  ;;  %vm1235_vm14 = vcmp.eq.s32.totalorder %v877_v58, 3 }
  0x32   : > { %vm1237_vm15 = vcmp.eq.s32.totalorder %v877_v58, 4 }
  0x34   : > { %1282 = vmatmul.mubr.msk.bf16.gmra.mrb[4].mxu0 %vm308_vm1, %v1376_v15 }
  0x35   : > { %1285 = vmatprep.mubr.msk.bf16.mxu0 %vm1507_vm0, %v1506_v4  ;;  %vm1239_vm0 = vcmp.eq.s32.totalorder %v877_v58, 5 }
  0x3c   : > { %1286 = vmatmul.mubr.msk.bf16.gmra.mrb[8].mxu0 %vm308_vm1, %v1377_v16  ;;  %vm1241_vm1 = vcmp.eq.s32.totalorder %v877_v58, 6 }
  0xa1   : > { %v266_v17 = vpop.permute.xlu0 %265 }
  0xa5   : > { %v271_v21 = vpop.permute.xlu0 %270 }
  0xff   : > { %v352_v18 = vpop.f32.mrb[0].mxu0 }
 0x100   : > { %v1279_v19 = vpop.f32.mrb[1].mxu0  ;;  %v353_v20 = vadd.f32 %v352_v18, %v266_v17 }
 0x101   : > { %v355_v22 = vpop.f32.mrb[2].mxu0 }
 0x102   : > { %v356_v23 = vadd.f32 %v355_v22, %v271_v21  ;;  %v1280_v24 = vpop.f32.mrb[3].mxu0  ;;  %v375_v25 = vpack.c.bf16 %v353_v20, %v353_v20 }
 0x104   : > { %v376_v26 = vpack.c.bf16 %v356_v23, %v356_v23  ;;  %377 = vxpose.xlu1.c.b16.start.end [1/1] (short) %v375_v25, 128 }
 0x106   : > { %v420_v27 = vsel %vm418_vm2, %v376_v26, 0  ;;  %1327 = vmatprep.subr.msk.bf16.mxu0 %vm418_vm2, %v376_v26  ;;  %vm1243_vm2 = vcmp.eq.s32.totalorder %v877_v58, 7 }
 0x107   : > { %1290 = vmatpush3.bf16.msra.mxu0 %v420_v27  ;;  %v1635_v28 = vpop.f32.mrb[4].mxu0 }
 0x108   : > { %1374 = vset.pattern.permute.xlu1 %v1508_v5  ;;  %v1283_v29 = vpop.f32.mrb[5].mxu0 }
 0x109   : > { %v1637_v30 = vpop.f32.mrb[6].mxu0 }
 0x10a   : > { %v1284_v31 = vpop.f32.mrb[7].mxu0 }
 0x10f   : > { %v1639_v32 = vpop.f32.mrb[8].mxu0 }
 0x110   : > { %v1287_v33 = vpop.f32.mrb[9].mxu0 }
 0x111   : > { %v1641_v34 = vpop.f32.mrb[10].mxu0 }
 0x112   : > { %v1288_v35 = vpop.f32.mrb[11].mxu0 }
 0x16a   : > { %v385_v36 = vpop.trf.xlu1 }
 0x16b   : > { %1291 = vmatprep.mubr.msk.bf16.mxu0 %vm393_vm3, %v385_v36 }
 0x16e   : > { %v386_v37 = vpop.trf.xlu1 }
 0x16f   : > { %1292 = vmatmul.mubr.msk.bf16.vlgmr.msra.gmra.mrb[12].mxu0 %vm393_vm3, %v386_v37 }
 0x172   : > { %v387_v38 = vpop.trf.xlu1 }
 0x173   : > { %1295 = vmatprep.mubr.msk.bf16.mxu0 %vm393_vm3, %v387_v38 }
 0x176   : > { %v388_v39 = vpop.trf.xlu1 }
 0x177   : > { %1296 = vmatmul.mubr.msk.bf16.gmra.mrb[16].mxu0 %vm393_vm3, %v388_v39 }
 0x17a   : > { %v389_v40 = vpop.trf.xlu1 }
 0x17b   : > { %1299 = vmatprep.mubr.msk.bf16.mxu0 %vm393_vm3, %v389_v40 }
 0x17e   : > { %v390_v41 = vpop.trf.xlu1 }
 0x17f   : > { %1300 = vmatmul.mubr.msk.bf16.gmra.mrb[20].mxu0 %vm393_vm3, %v390_v41 }
 0x182   : > { %v391_v42 = vpop.trf.xlu1 }
 0x183   : > { %1303 = vmatprep.mubr.msk.bf16.mxu0 %vm393_vm3, %v391_v42 }
 0x186   : > { %v392_v43 = vpop.trf.xlu1 }
 0x187   : > { %1304 = vmatmul.mubr.msk.bf16.gmra.mrb[24].mxu0 %vm393_vm3, %v392_v43 }
 0x242   : > { %v1293_v59 = vpop.f32.mrb[12].mxu0 }
 0x243   : > { %v456_v60 = vpop.f32.mrb[13].mxu0  ;;  %v896_v2 = vsel %vm1231_vm12, %v1293_v59, -1e+30 }
 0x244   : > { %v1294_v61 = vpop.f32.mrb[14].mxu0  ;;  %v894_v62 = vsel %vm1229_vm11, %v456_v60, -1e+30 }
 0x245   : > { %910 = vmax.xlane.f32.xlu1 %v894_v62  ;;  %v459_v63 = vpop.f32.mrb[15].mxu0  ;;  %v897_v10 = vsel %vm1231_vm12, %v1294_v61, -1e+30 }
 0x246   : > { %v895_v0 = vsel %vm1229_vm11, %v459_v63, -1e+30 }
 0x247   : > { %912 = vmax.xlane.f32.xlu0 %v895_v0 }
 0x24a   : > { %v1297_v1 = vpop.f32.mrb[16].mxu0 }
 0x24b   : > { %914 = vmax.xlane.f32.xlu0 %v896_v2  ;;  %v472_v3 = vpop.f32.mrb[17].mxu0  ;;  %v900_v12 = vsel %vm1235_vm14, %v1297_v1, -1e+30 }
 0x24c   : > { %v898_v4 = vsel %vm1233_vm13, %v472_v3, -1e+30  ;;  %v1298_v6 = vpop.f32.mrb[18].mxu0 }
 0x24d   : > { %918 = vmax.xlane.f32.xlu1 %v898_v4  ;;  %v475_v5 = vpop.f32.mrb[19].mxu0  ;;  %v901_v19 = vsel %vm1235_vm14, %v1298_v6, -1e+30 }
 0x24e   : > { %v899_v13 = vsel %vm1233_vm13, %v475_v5, -1e+30 }
 0x24f   : > { %916 = vmax.xlane.f32.xlu0 %v897_v10 }
 0x251   : > { %922 = vmax.xlane.f32.xlu1 %v900_v12 }
 0x252   : > { %v1301_v14 = vpop.f32.mrb[20].mxu0 }
 0x253   : > { %920 = vmax.xlane.f32.xlu0 %v899_v13  ;;  %v488_v15 = vpop.f32.mrb[21].mxu0  ;;  %v1661_v20 = vsel %vm1239_vm0, %v1301_v14, -1e+30 }
 0x254   : > { %v902_v16 = vsel %vm1237_vm15, %v488_v15, -1e+30  ;;  %v1302_v17 = vpop.f32.mrb[22].mxu0 }
 0x255   : > { %926 = vmax.xlane.f32.xlu1 %v902_v16  ;;  %v491_v18 = vpop.f32.mrb[23].mxu0  ;;  %v1670_v25 = vsel %vm1239_vm0, %v1302_v17, -1e+30 }
 0x256   : > { %v1663_v21 = vsel %vm1237_vm15, %v491_v18, -1e+30 }
 0x257   : > { %924 = vmax.xlane.f32.xlu0 %v901_v19 }
 0x259   : > { %930 = vmax.xlane.f32.xlu1 %v1661_v20 }
 0x25a   : > { %v1305_v22 = vpop.f32.mrb[24].mxu0 }
 0x25b   : > { %928 = vmax.xlane.f32.xlu0 %v1663_v21  ;;  %v504_v23 = vpop.f32.mrb[25].mxu0  ;;  %v1673_v29 = vsel %vm1243_vm2, %v1305_v22, -1e+30 }
 0x25c   : > { %v1667_v24 = vsel %vm1241_vm1, %v504_v23, -1e+30  ;;  %v1306_v26 = vpop.f32.mrb[26].mxu0 }
 0x25d   : > { %934 = vmax.xlane.f32.xlu1 %v1667_v24  ;;  %v507_v27 = vpop.f32.mrb[27].mxu0  ;;  %v1680_v33 = vsel %vm1243_vm2, %v1306_v26, -1e+30 }
 0x25e   : > { %v1676_v31 = vsel %vm1241_vm1, %v507_v27, -1e+30 }
 0x25f   : > { %932 = vmax.xlane.f32.xlu0 %v1670_v25 }
 0x261   : > { %938 = vmax.xlane.f32.xlu1 %v1673_v29 }
 0x263   : > { %936 = vmax.xlane.f32.xlu0 %v1676_v31 }
 0x267   : > { %940 = vmax.xlane.f32.xlu0 %v1680_v33 }
 0x2d2   : > { %v911_v35 = vpop.xlane.xlu1 %910 }
 0x2d3   : > { %v942_v36 = vsub.f32 %v894_v62, %v911_v35 }
 0x2d4   : > { %v913_v37 = vpop.xlane.xlu0 %912 }
 0x2d5   : > { %v958_v38 = vmul.f32 1.442695, %v942_v36  ;;  %v943_v39 = vsub.f32 %v895_v0, %v913_v37 }
 0x2d7   : > { %1378 = vpow2.f32 %v958_v38  ;;  %v960_v40 = vmul.f32 1.442695, %v943_v39 }
 0x2d8   : > { %v915_v41 = vpop.xlane.xlu0 %914 }
 0x2d9   : > { %1380 = vpow2.f32 %v960_v40  ;;  %v944_v42 = vsub.f32 %v896_v2, %v915_v41 }
 0x2da   : > { %v919_v43 = vpop.xlane.xlu1 %918 }
 0x2db   : > { %v962_v44 = vmul.f32 1.442695, %v944_v42  ;;  %v946_v45 = vsub.f32 %v898_v4, %v919_v43  ;;  %v259_v43 = vld [vmem:[%s1831_s3 + $0x10] sm:$0xff] }
 0x2dc   : > { %v917_v46 = vpop.xlane.xlu0 %916 }
 0x2dd   : > { %1382 = vpow2.f32 %v962_v44  ;;  %v966_v47 = vmul.f32 1.442695, %v946_v45  ;;  %v945_v48 = vsub.f32 %v897_v10, %v917_v46  ;;  %v261_v44 = vld [vmem:[%s1831_s3 + $0x20] sm:$0xff]  ;;  %v260_v45 = vld [vmem:[%s1831_s3 + $0x18] sm:$0xff]  ;;  %v262_v46 = vld [vmem:[%s1831_s3 + $0x28] sm:$0xff] }
 0x2de   : > { %v923_v49 = vpop.xlane.xlu1 %922 }
 0x2df   : > { %v964_v50 = vmul.f32 1.442695, %v945_v48  ;;  %v948_v51 = vsub.f32 %v900_v12, %v923_v49  ;;  %1384 = vpow2.f32 %v966_v47 }
 0x2e0   : > { %v921_v52 = vpop.xlane.xlu0 %920 }
 0x2e1   : > { %v1683_v53 = vpop.eup %1378  ;;  %1386 = vpow2.f32 %v964_v50  ;;  %v970_v54 = vmul.f32 1.442695, %v948_v51  ;;  %v947_v55 = vsub.f32 %v899_v13, %v921_v52 }
 0x2e2   : > { %v927_v56 = vpop.xlane.xlu1 %926  ;;  %990 = vadd.xlane.f32.xlu1 %v1683_v53 }
 0x2e3   : > { %v1686_v57 = vpop.eup %1380  ;;  %v968_v58 = vmul.f32 1.442695, %v947_v55  ;;  %v950_v59 = vsub.f32 %v902_v16, %v927_v56  ;;  %1388 = vpow2.f32 %v970_v54 }
 0x2e4   : > { %v925_v60 = vpop.xlane.xlu0 %924  ;;  %992 = vadd.xlane.f32.xlu0 %v1686_v57 }
 0x2e5   : > { %1390 = vpow2.f32 %v968_v58  ;;  %v974_v61 = vmul.f32 1.442695, %v950_v59  ;;  %v949_v62 = vsub.f32 %v901_v19, %v925_v60 }
 0x2e6   : > { %v931_v63 = vpop.xlane.xlu1 %930 }
 0x2e7   : > { %v1689_v0 = vpop.eup %1382  ;;  %v972_v1 = vmul.f32 1.442695, %v949_v62  ;;  %v952_v2 = vsub.f32 %v1661_v20, %v931_v63  ;;  %1392 = vpow2.f32 %v974_v61 }
 0x2e8   : > { %v929_v3 = vpop.xlane.xlu0 %928  ;;  %994 = vadd.xlane.f32.xlu1 %v1689_v0 }
 0x2e9   : > { %1394 = vpow2.f32 %v972_v1  ;;  %v978_v4 = vmul.f32 1.442695, %v952_v2  ;;  %v951_v6 = vsub.f32 %v1663_v21, %v929_v3  ;;  %v1694_v5 = vpop.eup %1384 }
 0x2ea   : > { %v935_v10 = vpop.xlane.xlu1 %934 }
 0x2eb   : > { %v1696_v12 = vpop.eup %1386  ;;  %v976_v13 = vmul.f32 1.442695, %v951_v6  ;;  %1396 = vpow2.f32 %v978_v4  ;;  %v954_v19 = vsub.f32 %v1667_v24, %v935_v10 }
 0x2ec   : > { %v933_v14 = vpop.xlane.xlu0 %932  ;;  %998 = vadd.xlane.f32.xlu1 %v1694_v5  ;;  %996 = vadd.xlane.f32.xlu0 %v1696_v12 }
 0x2ed   : > { %1398 = vpow2.f32 %v976_v13  ;;  %v953_v15 = vsub.f32 %v1670_v25, %v933_v14  ;;  %v1701_v16 = vpop.eup %1388  ;;  %v982_v35 = vmul.f32 1.442695, %v954_v19 }
 0x2ee   : > { %v939_v17 = vpop.xlane.xlu1 %938 }
 0x2ef   : > { %v1703_v18 = vpop.eup %1390  ;;  %v980_v20 = vmul.f32 1.442695, %v953_v15  ;;  %v956_v21 = vsub.f32 %v1673_v29, %v939_v17 }
 0x2f0   : > { %1002 = vadd.xlane.f32.xlu1 %v1701_v16  ;;  %1000 = vadd.xlane.f32.xlu0 %v1703_v18  ;;  %v937_v22 = vpop.xlane.xlu0 %936 }
 0x2f1   : > { %1400 = vpow2.f32 %v980_v20  ;;  %v986_v23 = vmul.f32 1.442695, %v956_v21  ;;  %v955_v26 = vsub.f32 %v1676_v31, %v937_v22  ;;  %v1710_v25 = vpop.eup %1392 }
 0x2f3   : > { %v1712_v27 = vpop.eup %1394  ;;  %1402 = vpow2.f32 %v986_v23  ;;  %v984_v36 = vmul.f32 1.442695, %v955_v26 }
 0x2f4   : > { %1006 = vadd.xlane.f32.xlu1 %v1710_v25  ;;  %1004 = vadd.xlane.f32.xlu0 %v1712_v27  ;;  %v941_v24 = vpop.xlane.xlu0 %940 }
 0x2f5   : > { %1404 = vpow2.f32 %v984_v36  ;;  %v957_v29 = vsub.f32 %v1680_v33, %v941_v24  ;;  %v1717_v37 = vpop.eup %1396 }
 0x2f6   : > { %1406 = vpow2.f32 %v982_v35 }
 0x2f7   : > { %v1719_v38 = vpop.eup %1398  ;;  %v988_v31 = vmul.f32 1.442695, %v957_v29 }
 0x2f8   : > { %1010 = vadd.xlane.f32.xlu1 %v1717_v37  ;;  %1008 = vadd.xlane.f32.xlu0 %v1719_v38 }
 0x2f9   : > { %1408 = vpow2.f32 %v988_v31 }
 0x2fb   : > { %v1723_v39 = vpop.eup %1400 }
 0x2fc   : > { %1012 = vadd.xlane.f32.xlu0 %v1723_v39 }
 0x2fd   : > { %v1726_v40 = vpop.eup %1402 }
 0x2fe   : > { %1018 = vadd.xlane.f32.xlu1 %v1726_v40 }
 0x2ff   : > { %v1729_v33 = vpop.eup %1404 }
 0x300   : > { %1016 = vadd.xlane.f32.xlu0 %v1729_v33  ;;  %v1732_v41 = vpop.eup %1406 }
 0x302   : > { %1014 = vadd.xlane.f32.xlu1 %v1732_v41 }
 0x303   : > { %v1735_v42 = vpop.eup %1408 }
 0x304   : > { %1020 = vadd.xlane.f32.xlu0 %v1735_v42 }
 0x313   : > { %275 = vperm.xlu1 %1374, %v259_v43  }
 0x317   : > { %285 = vperm.xlu1 %1374, %v261_v44  }
 0x31a   : > { %280 = vperm.xlu0 %1373, %v260_v45  }
 0x31b   : > { %290 = vperm.xlu1 %1374, %v262_v46  }
 0x36f   : > { %v991_v47 = vpop.xlane.xlu1 %990 }
 0x370   : > { %1410 = vrcp.f32 %v991_v47 }
 0x371   : > { %v993_v48 = vpop.xlane.xlu0 %992 }
 0x372   : > { %1412 = vrcp.f32 %v993_v48 }
 0x375   : > { %v995_v49 = vpop.xlane.xlu1 %994 }
 0x376   : > { %1414 = vrcp.f32 %v995_v49 }
 0x379   : > { %v999_v50 = vpop.xlane.xlu1 %998  ;;  %v997_v51 = vpop.xlane.xlu0 %996 }
 0x37a   : > { %v1411_v52 = vpop.eup %1410  ;;  %1416 = vrcp.f32 %v997_v51 }
 0x37b   : > { %1418 = vrcp.f32 %v999_v50  ;;  %v1038_v58 = vmul.f32 %v1411_v52, %v1683_v53 }
 0x37c   : > { %v1413_v54 = vpop.eup %1412 }
 0x37d   : > { %v1003_v55 = vpop.xlane.xlu1 %1002  ;;  %v1001_v56 = vpop.xlane.xlu0 %1000  ;;  %v1039_v59 = vmul.f32 %v1413_v54, %v1686_v57 }
 0x37e   : > { %1420 = vrcp.f32 %v1001_v56 }
 0x37f   : > { %v1056_v60 = vpack.c.bf16 %v1039_v59, %v1038_v58  ;;  %1422 = vrcp.f32 %v1003_v55 }
 0x380   : > { %v1415_v63 = vpop.eup %1414 }
 0x381   : > { %v1007_v61 = vpop.xlane.xlu1 %1006  ;;  %1307 = vmatprep.subr.bf16.mxu1 %v1056_v60  ;;  %v1005_v62 = vpop.xlane.xlu0 %1004  ;;  %v1040_v3 = vmul.f32 %v1415_v63, %v1689_v0 }
 0x382   : > { %1308 = vmatpush3.bf16.xpose.msra.mxu1 %v1056_v60  ;;  %1424 = vrcp.f32 %v1005_v62 }
 0x384   : > { %v1417_v1 = vpop.eup %1416 }
 0x385   : > { %v1009_v2 = vpop.xlane.xlu0 %1008  ;;  %v1041_v4 = vmul.f32 %v1417_v1, %v1696_v12  ;;  %v1419_v6 = vpop.eup %1418 }
 0x386   : > { %v1011_v10 = vpop.xlane.xlu1 %1010  ;;  %1426 = vrcp.f32 %v1009_v2  ;;  %v1042_v14 = vmul.f32 %v1419_v6, %v1694_v5 }
 0x387   : > { %v1057_v53 = vpack.c.bf16 %v1041_v4, %v1040_v3  ;;  %1428 = vrcp.f32 %v1007_v61 }
 0x388   : > { %v1421_v13 = vpop.eup %1420 }
 0x389   : > { %v1013_v57 = vpop.xlane.xlu0 %1012  ;;  %1309 = vmatprep.subr.bf16.mxu1 %v1057_v53  ;;  %v1043_v15 = vmul.f32 %v1421_v13, %v1703_v18  ;;  %v1423_v19 = vpop.eup %1422 }
 0x38a   : > { %1310 = vmatpush3.bf16.xpose.msra.mxu1 %v1057_v53  ;;  %v1044_v23 = vmul.f32 %v1423_v19, %v1701_v16  ;;  %1430 = vrcp.f32 %v1013_v57 }
 0x38b   : > { %v1019_v17 = vpop.xlane.xlu1 %1018  ;;  %v1058_v20 = vpack.c.bf16 %v1043_v15, %v1042_v14  ;;  %1432 = vrcp.f32 %v1011_v10 }
 0x38c   : > { %v1425_v21 = vpop.eup %1424 }
 0x38d   : > { %1311 = vmatprep.subr.bf16.mxu1 %v1058_v20  ;;  %v1045_v0 = vmul.f32 %v1425_v21, %v1712_v27  ;;  %v1017_v12 = vpop.xlane.xlu0 %1016 }
 0x38f   : > { %v1015_v22 = vpop.xlane.xlu1 %1014  ;;  %v1059_v26 = vpack.c.bf16 %v1045_v0, %v1044_v23 }
 0x390   : > { %v1427_v35 = vpop.eup %1426  ;;  %1434 = vrcp.f32 %v1015_v22 }
 0x391   : > { %v1429_v18 = vpop.eup %1428  ;;  %v1021_v36 = vpop.xlane.xlu0 %1020  ;;  %v1047_v24 = vmul.f32 %v1427_v35, %v1719_v38  ;;  %1436 = vrcp.f32 %v1017_v12 }
 0x392   : > { %1312 = vmatpush3.bf16.xpose.msra.mxu1 %v1058_v20  ;;  %v1046_v31 = vmul.f32 %v1429_v18, %v1710_v25  ;;  %1438 = vrcp.f32 %v1021_v36 }
 0x393   : > { %v276_v5 = vpop.permute.xlu1 %275  ;;  %1313 = vmatprep.subr.bf16.mxu1 %v1059_v26  ;;  %1440 = vrcp.f32 %v1019_v17 }
 0x394   : > { %v361_v43 = vadd.f32 %v1635_v28, %v276_v5  ;;  %v1060_v44 = vpack.c.bf16 %v1047_v24, %v1046_v31  ;;  %v1431_v45 = vpop.eup %1430 }
 0x395   : > { %v1433_v49 = vpop.eup %1432  ;;  %v1049_v25 = vmul.f32 %v1431_v45, %v1723_v39 }
 0x396   : > { %v1048_v28 = vmul.f32 %v1433_v49, %v1717_v37 }
 0x397   : > { %v286_v29 = vpop.permute.xlu1 %285 }
 0x398   : > { %v369_v47 = vadd.f32 %v1639_v32, %v286_v29 }
 0x399   : > { %v281_v27 = vpop.permute.xlu0 %280 }
 0x39a   : > { %v364_v16 = vadd.f32 %v1637_v30, %v281_v27  ;;  %1314 = vmatpush3.bf16.xpose.msra.mxu1 %v1059_v26  ;;  %v1061_v30 = vpack.c.bf16 %v1049_v25, %v1048_v28  ;;  %v1435_v51 = vpop.eup %1434 }
 0x39b   : > { %v291_v46 = vpop.permute.xlu1 %290  ;;  %1315 = vmatprep.subr.bf16.mxu1 %v1060_v44  ;;  %v1437_v52 = vpop.eup %1436  ;;  %v1050_v32 = vmul.f32 %v1435_v51, %v1732_v41  ;;  %v1113_v41 = vstv %s244_s14 }
 0x39c   : > { %v372_v48 = vadd.f32 %v1641_v34, %v291_v46  ;;  %v1054_v38 = vpack.c.bf16 %v364_v16, %v361_v43  ;;  %v1051_v34 = vmul.f32 %v1437_v52, %v1729_v33  ;;  %v1439_v55 = vpop.eup %1438 }
 0x39d   : > { %v1441_v56 = vpop.eup %1440  ;;  %v1053_v39 = vmul.f32 %v1439_v55, %v1735_v42 }
 0x39e   : > { %v1055_v50 = vpack.c.bf16 %v372_v48, %v369_v47  ;;  %1323 = vmatprep.mubr.bf16.mxu1 %v1054_v38  ;;  %v1062_v54 = vpack.c.bf16 %v1051_v34, %v1050_v32  ;;  %v1052_v37 = vmul.f32 %v1441_v56, %v1726_v40 }
 0x3a0   : > { %v1063_v58 = vpack.c.bf16 %v1053_v39, %v1052_v37 }
 0x3a2   : > { %1316 = vmatpush3.bf16.xpose.msra.mxu1 %v1060_v44 }
 0x3a3   : > { %1317 = vmatprep.subr.bf16.mxu1 %v1061_v30 }
 0x3aa   : > { %1318 = vmatpush3.bf16.xpose.msra.mxu1 %v1061_v30 }
 0x3ab   : > { %1319 = vmatprep.subr.bf16.mxu1 %v1062_v54 }
 0x3b2   : > { %1320 = vmatpush3.bf16.xpose.msra.mxu1 %v1062_v54 }
 0x3b3   : > { %1321 = vmatprep.subr.bf16.mxu1 %v1063_v58 }
 0x3ba   : > { %1322 = vmatpush3.bf16.xpose.msra.mxu1 %v1063_v58 }
 0x3c1   : > { %1324 = vmatmul.mubr.bf16.vlgmr.msra.gmra.mrb[0].mxu1 %v1055_v50 }
 0x494   : > { %v1325_v59 = vpop.f32.mrb[0].mxu1 }
 0x495   : > { %v1116_v33 = vmul.f32 %v1325_v59, %v1113_v41  ;;  %v1098_v60 = vpop.f32.mrb[1].mxu1 }
 0x496   : > { %v1114_v61 = vmul.f32 %v1113_v41, %v1098_v60  ;;  %v1326_v62 = vpop.f32.mrb[2].mxu1 }
 0x497   : > { %v1120_v42 = vadd.f32 %v1116_v33, %v1612_v9  ;;  %v1117_v40 = vmul.f32 %v1326_v62, %v1113_v41  ;;  %v1101_v63 = vpop.f32.mrb[3].mxu1 }
 0x498   : > { %v1118_v1 = vadd.f32 %v1114_v61, %v1608_v7  ;;  %v1115_v2 = vmul.f32 %v1113_v41, %v1101_v63 }
 0x499   : > { %1124 = vst [vmem:[%s242_s15 + $0x10] sm:$0xff] %v1120_v42  ;;  %v1121_v3 = vadd.f32 %v1117_v40, %v1616_v11 }
 0x49a   : > { %1122 = vst [vmem:[%s242_s15] sm:$0xff] %v1118_v1  ;;  %v1119_v9 = vadd.f32 %v1115_v2, %v1610_v8 }
 0x49b   : > { %1125 = vst [vmem:[%s242_s15 + $0x18] sm:$0xff] %v1121_v3 }
 0x49c   : > { %1123 = vst [vmem:[%s242_s15 + $0x8] sm:$0xff] %v1119_v9 }
 0x49d   : > { %1455 = shalt.err (!%p1452_p5)
}
 0x49e   : > { %s1456_s9 = scalar_lea.hbm %s1781_s0, 512  ;;  %s1460_s8 = scalar_lea.hbm %s1832_s4, 1024 }
 0x49f   : > { %p1457_p7 = scmp.ne.s32.totalorder %s1781_s0, %s1456_s9  ;;  %p1461_p12 = scmp.lt.u32.totalorder %s1781_s0, %s1832_s4 }
 0x4a0   : > { %p1462_p13 = scmp.lt.u32.totalorder %s1460_s8, %s1456_s9  ;;  %p1464_p1 = scmp.lt.u32.totalorder %s1456_s9, %s1781_s0 }
 0x4a1   : > { %p1458_p10 = pnand %p1457_p7, %p1579_p6 }
 0x4a2   : > { %p1463_p0 = por %p1462_p13, %p1461_p12 }
 0x4a3   : > { %p1459_p11 = pneg %p1458_p10 }
 0x4a4   : > { %p1465_p2 = por %p1464_p1, %p1463_p0 }
 0x4a6   : > { %p1466_p3 = pnand %p1465_p2, %p1459_p11 }
 0x4a8   : > { %1469 = shalt.err (!%p1466_p3)
}
 0x4a9   : > { %s1510_s13 = smov 128   ;;  %s1511_s14 = smov 256  }
 0x4aa   : > { %s1512_s15 = smov 8  }
 0x4ab   : > { %1328 = dma.vmem_to_hbm [thread:$0]  (%p1579_p6), %s1774_s16, 512, %s1781_s0, %s1786_s24, %s1510_s13, %s1511_s14, %s1512_s15  }
 0x4ac PF: > { %s1154_s21 = sand.u32 1, %s1492_s17   ;;  %p1331_p4 = pnand %p1209_p9, %p1583_p8 }
 0x4ad   : > { %s1155_s10 = scalar_lea.sflag [#allocation5], %s1154_s21 }
 0x4ae   : > { %1487 = dma.done.wait (!%p1331_p4), %s1155_s10, 512  }
 0x4af   : > { %1489 = vsyncadd (!%p1331_p4), %s1155_s10, 4294966784  ;;  %p15_p5 = scmp.ge.s32.totalorder %s1564_s22, 4   ;;  %s1835_s17 = smov %s1496_s18 }
 0x4b0   : > { %s1836_s18 = smov %s1500_s19  ;;  %s1837_s19 = smov %s1577_s25 }
 0x4b1   : > { %s1838_s20 = smov %s1564_s22  ;;  %17 = sbr.rel (!%p15_p5) target bundleno = 5 (0x5), region = 114 }
 0x4b8   :  { %1160 = vsyncpa [#allocation5], 1 }
 0x4b9   :  { %1162 = vsyncpa [#allocation5 + $0x1], 1 }

// kernel: tpu_custom_call.1
= control target key start
LH: loop header
LB: loop body
LE: loop exit
PB: predicated region body
PF: predicated region fallthrough
CT: control target
= control target key end

     0   :  { %s1828_s0 = inlined_call_operand.<no memory space> [shape: f32[1,1], index: 0, kind: input, shape index: {}]   ;;  %s1829_s1 = inlined_call_operand.vmem [shape: f32[32,256], index: 1, kind: input, shape index: {}]   ;;  %s1830_s2 = inlined_call_operand.vmem [shape: bf16[48,32], index: 2, kind: input, shape index: {}]   ;;  %s1831_s3 = inlined_call_operand.vmem [shape: f32[48,1], index: 3, kind: input, shape index: {}]   ;;  %s1832_s4 = inlined_call_operand.hbm [shape: f32[32,256], index: 4, kind: output, shape index: {}]  }
   0x1   :  { %9 = sst [smem:[#allocation2]] %s1828_s0 }
   0x2   :  { %10 = vsyncpa [#allocation5], 0 }
   0x3   :  { %12 = vsyncpa [#allocation5 + $0x1], 0  ;;  %s1541_s17 = smov 0   ;;  %s1543_s18 = smov 0  }
   0x4   :  { %s1545_s19 = smov 0   ;;  %s1547_s20 = smov 0  }
   0x5 LB: > { %s1206_s0 = sadd.s32 4294967295, %s1504_s20   ;;  %s1207_s21 = sadd.s32 4294967294, %s1504_s20   ;;  %s1504_s20 = sphi %s1547_s20, %s1838_s20   ;;  %s1500_s19 = sphi %s1545_s19, %s1837_s19   ;;  %s1496_s18 = sphi %s1543_s18, %s1836_s18   ;;  %s1492_s17 = sphi %s1541_s17, %s1835_s17  }
   0x6   : > { %s1564_s22 = sadd.s32 1, %s1504_s20   ;;  %s46_s23 = sadd.s32 1, %s1500_s19 }
   0x7   : > { %s43_s24 = ssub.s32 %s1504_s20, %s1564_s22  ;;  %p53_p0 = scmp.ne.s32.totalorder %s1500_s19, %s1496_s18 }
   0x8   : > { %p44_p1 = scmp.eq.s32.totalorder %s43_s24, 0  ;;  %p54_p2 = scmp.eq.s32.totalorder %s1504_s20, 0 }
   0x9   : > { %p125_p3 = scmp.eq.s32.totalorder %s1206_s0, 1  ;;  %p130_p4 = scmp.ne.s32.totalorder %s1496_s18, %s1492_s17 }
   0xa   : > { %s1577_s25 = scalar_select %p44_p1, %s1500_s19, %s46_s23  }
   0xb   : > { %p55_p5 = por %p54_p2, %p53_p0  ;;  %p1579_p6 = por %p125_p3, %p53_p0 }
   0xc   : > { %p131_p7 = scmp.eq.s32.totalorder %s1207_s21, 1  ;;  %p1209_p9 = scmp.ge.s32.totalorder %s1504_s20, 2 }
   0xe   : > { %p1583_p8 = por %p131_p7, %p130_p4  ;;  %156 = sbr.rel (%p1209_p9) target bundleno = 28 (0x1c), region = 28 }
  0x15   : > { %159 = sbr.rel (!%p55_p5) target bundleno = 28 (0x1c), region = 32  ;;  %s161_s28 = sand.u32 (%p55_p5), 1, %s1500_s19  }
  0x16   : > { %s1211_s29 = sshll.u32 (%p55_p5), %s1504_s20, 3  ;;  %s1210_s30 = sshll.u32 (%p55_p5), %s161_s28, 5 }
  0x17   : > { %s165_s7 = scalar_lea.vmem (%p55_p5), %s1829_s1, %s1211_s29  ;;  %s163_s8 = scalar_lea.vmem (%p55_p5), [#allocation3], %s1210_s30 }
  0x18   : > { %v199_v0 = vld [vmem:[%s165_s7] sm:$0xff] (%p55_p5)  ;;  %v201_v1 = vld [vmem:[%s165_s7 + $0x10] sm:$0xff] (%p55_p5) }
  0x19   : > { %v203_v2 = vld [vmem:[%s165_s7 + $0x20] sm:$0xff] (%p55_p5)  ;;  %200 = vst [vmem:[%s163_s8] sm:$0xff] (%p55_p5), %v199_v0  ;;  %202 = vst [vmem:[%s163_s8 + $0x8] sm:$0xff] (%p55_p5), %v201_v1  ;;  %v205_v3 = vld [vmem:[%s165_s7 + $0x30] sm:$0xff] (%p55_p5) }
  0x1a   : > { %204 = vst [vmem:[%s163_s8 + $0x10] sm:$0xff] (%p55_p5), %v203_v2  ;;  %206 = vst [vmem:[%s163_s8 + $0x18] sm:$0xff] (%p55_p5), %v205_v3 }
  0x1c PF: > { %p1212_p10 = scmp.ge.s32.totalorder %s1504_s20, 1  ;;  %p211_p11 = scmp.lt.s32.totalorder %s1504_s20, 3 }
  0x1e   : > { %p212_p12 = pnand %p1212_p10, %p211_p11 }
  0x1f   : > { %s218_s9 = sand.u32 (!%p212_p12), 1, %s1496_s18   ;;  %v1506_v4 = vmov (!%p212_p12), 0.0   ;;  %vm1507_vm0 = vmmov (!%p212_p12), 0   ;;  %v1508_v5 = vmov (!%p212_p12), 0   ;;  %v257_v6 = vld [vmem:[%s1831_s3] sm:$0xff] (!%p212_p12)  ;;  %v258_v12 = vld [vmem:[%s1831_s3 + $0x8] sm:$0xff] (!%p212_p12)  ;;  %v536_v44 = vlaneseq (!%p212_p12) }
  0x20   : > { %215 = sbr.rel (%p212_p12) target bundleno = 1196 (0x4ac), region = 70  ;;  %1273 = vmatprep.subr.bf16.mxu0 (!%p212_p12), %v1506_v4  ;;  %s1600_s10 = sshll.u32 (!%p212_p12), %s218_s9, 5  ;;  %1277 = vmatprep.mubr.msk.bf16.mxu0 (!%p212_p12), %vm1507_vm0, %v1506_v4  ;;  %v1375_v14 = vld [vmem:[%s1830_s2] sm:$0xff] (!%p212_p12)   ;;  %vm308_vm1 = vcmask (!%p212_p12), 261120   ;;  %v1376_v15 = vld [vmem:[%s1830_s2 + $0x8] sm:$0xff] (!%p212_p12)   ;;  %v1377_v16 = vld [vmem:[%s1830_s2 + $0x10] sm:$0xff] (!%p212_p12)  }
  0x21   : > { %1373 = vset.pattern.permute.xlu0 (!%p212_p12), %v1508_v5  ;;  %s220_s13 = scalar_lea.vmem (!%p212_p12), [#allocation3], %s1600_s10  ;;  %vm418_vm2 = vcmask (!%p212_p12), 1043456   ;;  %vm393_vm3 = vcmask (!%p212_p12), 64512   ;;  %v537_v45 = vand.u32 (!%p212_p12), 127, %v536_v44  ;;  %s244_s14 = sld [smem:[#allocation2]] (!%p212_p12) }
  0x22   : > { %v1608_v7 = vld [vmem:[%s220_s13] sm:$0xff] (!%p212_p12)  ;;  %v1610_v8 = vld [vmem:[%s220_s13 + $0x8] sm:$0xff] (!%p212_p12)  ;;  %v1612_v9 = vld [vmem:[%s220_s13 + $0x10] sm:$0xff] (!%p212_p12)  ;;  %265 = vperm.xlu0 (!%p212_p12), %1373, %v257_v6   ;;  %s242_s15 = scalar_lea.vmem (!%p212_p12), [#allocation4], %s1600_s10  ;;  %s1246_s21 = sshll.u32 (!%p212_p12), %s1206_s0, 7 }
  0x23   : > { %v255_v10 = vpack.c.bf16 (!%p212_p12), %v1610_v8, %v1608_v7  ;;  %v1616_v11 = vld [vmem:[%s220_s13 + $0x18] sm:$0xff] (!%p212_p12)  ;;  %vm570_vm4 = vcmp.ge.s32.totalorder (!%p212_p12), %v537_v45, 16  ;;  %vm620_vm5 = vcmp.ge.s32.totalorder (!%p212_p12), %v537_v45, 32  ;;  %vm671_vm6 = vcmp.ge.s32.totalorder (!%p212_p12), %v537_v45, 48  ;;  %s1139_s16 = sshll.u32 (!%p212_p12), %s242_s15, 4  ;;  %s1781_s0 = scalar_lea.hbm (!%p212_p12), %s1832_s4, %s1246_s21  ;;  %s1774_s16 = int_to_ptr.vmem [resolvable:$true] %s1139_s16 }
  0x24   : > { %v256_v13 = vpack.c.bf16 (!%p212_p12), %v1616_v11, %v1612_v9  ;;  %v571_v46 = vsel (!%p212_p12), %vm570_vm4, 1, %v1508_v5  ;;  %v621_v47 = vsel (!%p212_p12), %vm620_vm5, 1, %v1508_v5  ;;  %v672_v49 = vsel (!%p212_p12), %vm671_vm6, 1, %v1508_v5  ;;  %s1786_s24 = scalar_lea.sflag (!%p212_p12), [#allocation5], %s218_s9  ;;  %s1442_s28 = scalar_lea.vmem (!%p212_p12), %s1774_s16, 512 }
  0x25   : > { %1274 = vmatpush3.bf16.msra.mxu0 (!%p212_p12), %v255_v10  ;;  %v622_v48 = vadd.s32 (!%p212_p12), %v621_v47, %v571_v46  ;;  %vm722_vm7 = vcmp.ge.s32.totalorder (!%p212_p12), %v537_v45, 64  ;;  %vm773_vm8 = vcmp.ge.s32.totalorder (!%p212_p12), %v537_v45, 80  ;;  %vm824_vm9 = vcmp.ge.s32.totalorder (!%p212_p12), %v537_v45, 96  ;;  %p1443_p13 = scmp.ne.s32.totalorder (!%p212_p12), %s1774_s16, %s1442_s28  ;;  %s1509_s29 = smov (!%p212_p12), [#allocation4]  }
  0x26   : > { %1275 = vmatprep.subr.bf16.mxu0 (!%p212_p12), %v1506_v4  ;;  %270 = vperm.xlu0 (!%p212_p12), %1373, %v258_v12   ;;  %v723_v51 = vsel (!%p212_p12), %vm722_vm7, 1, %v1508_v5  ;;  %v774_v53 = vsel (!%p212_p12), %vm773_vm8, 1, %v1508_v5  ;;  %v825_v55 = vsel (!%p212_p12), %vm824_vm9, 1, %v1508_v5  ;;  %vm875_vm10 = vcmp.ge.s32.totalorder (!%p212_p12), %v537_v45, 112  ;;  %s1446_s30 = sshll.u32 (!%p212_p12), %s1509_s29, 4  ;;  %s1447_s30 = int_to_ptr.vmem [resolvable:$false] %s1446_s30 }
  0x27   : > { %v673_v50 = vadd.s32 %v672_v49, %v622_v48  ;;  %v876_v57 = vsel %vm875_vm10, 1, %v1508_v5  ;;  %p1444_p0 = pnand %p1443_p13, %p1579_p6  ;;  %s1448_s5 = scalar_lea.vmem %s1447_s30, 1024 }
  0x28   : > { %p1449_p2 = scmp.lt.s32.totalorder %s1774_s16, %s1447_s30  ;;  %p1450_p3 = scmp.lt.s32.totalorder %s1448_s5, %s1442_s28 }
  0x29   : > { %1276 = vmatpush3.bf16.msra.mxu0 %v256_v13  ;;  %v724_v52 = vadd.s32 %v723_v51, %v673_v50  ;;  %p1445_p1 = pneg %p1444_p0 }
  0x2a   : > { %p1451_p4 = por %p1450_p3, %p1449_p2 }
  0x2b   : > { %v775_v54 = vadd.s32 %v774_v53, %v724_v52 }
  0x2c   : > { %1278 = vmatmul.mubr.msk.bf16.vlgmr.msra.gmra.mrb[0].mxu0 %vm308_vm1, %v1375_v14  ;;  %p1452_p5 = pnand %p1451_p4, %p1445_p1 }
  0x2d   : > { %1281 = vmatprep.mubr.msk.bf16.mxu0 %vm1507_vm0, %v1506_v4  ;;  %v826_v56 = vadd.s32 %v825_v55, %v775_v54 }
  0x2f   : > { %v877_v58 = vadd.s32 %v876_v57, %v826_v56 }
  0x31   : > { %vm1229_vm11 = vcmp.eq.s32.totalorder %v877_v58, 0  ;;  %vm1231_vm12 = vcmp.eq.s32.totalorder %v877_v58, 1  ;;  %vm1233_vm13 = vcmp.eq.s32.totalorder %v877_v58, 2  ;;  %vm1235_vm14 = vcmp.eq.s32.totalorder %v877_v58, 3 }
  0x32   : > { %vm1237_vm15 = vcmp.eq.s32.totalorder %v877_v58, 4 }
  0x34   : > { %1282 = vmatmul.mubr.msk.bf16.gmra.mrb[4].mxu0 %vm308_vm1, %v1376_v15 }
  0x35   : > { %1285 = vmatprep.mubr.msk.bf16.mxu0 %vm1507_vm0, %v1506_v4  ;;  %vm1239_vm0 = vcmp.eq.s32.totalorder %v877_v58, 5 }
  0x3c   : > { %1286 = vmatmul.mubr.msk.bf16.gmra.mrb[8].mxu0 %vm308_vm1, %v1377_v16  ;;  %vm1241_vm1 = vcmp.eq.s32.totalorder %v877_v58, 6 }
  0xa1   : > { %v266_v17 = vpop.permute.xlu0 %265 }
  0xa5   : > { %v271_v21 = vpop.permute.xlu0 %270 }
  0xff   : > { %v352_v18 = vpop.f32.mrb[0].mxu0 }
 0x100   : > { %v1279_v19 = vpop.f32.mrb[1].mxu0  ;;  %v353_v20 = vadd.f32 %v352_v18, %v266_v17 }
 0x101   : > { %v355_v22 = vpop.f32.mrb[2].mxu0 }
 0x102   : > { %v356_v23 = vadd.f32 %v355_v22, %v271_v21  ;;  %v1280_v24 = vpop.f32.mrb[3].mxu0  ;;  %v375_v25 = vpack.c.bf16 %v353_v20, %v353_v20 }
 0x104   : > { %v376_v26 = vpack.c.bf16 %v356_v23, %v356_v23  ;;  %377 = vxpose.xlu1.c.b16.start.end [1/1] (short) %v375_v25, 128 }
 0x106   : > { %v420_v27 = vsel %vm418_vm2, %v376_v26, 0  ;;  %1327 = vmatprep.subr.msk.bf16.mxu0 %vm418_vm2, %v376_v26  ;;  %vm1243_vm2 = vcmp.eq.s32.totalorder %v877_v58, 7 }
 0x107   : > { %1290 = vmatpush3.bf16.msra.mxu0 %v420_v27  ;;  %v1635_v28 = vpop.f32.mrb[4].mxu0 }
 0x108   : > { %1374 = vset.pattern.permute.xlu1 %v1508_v5  ;;  %v1283_v29 = vpop.f32.mrb[5].mxu0 }
 0x109   : > { %v1637_v30 = vpop.f32.mrb[6].mxu0 }
 0x10a   : > { %v1284_v31 = vpop.f32.mrb[7].mxu0 }
 0x10f   : > { %v1639_v32 = vpop.f32.mrb[8].mxu0 }
 0x110   : > { %v1287_v33 = vpop.f32.mrb[9].mxu0 }
 0x111   : > { %v1641_v34 = vpop.f32.mrb[10].mxu0 }
 0x112   : > { %v1288_v35 = vpop.f32.mrb[11].mxu0 }
 0x16a   : > { %v385_v36 = vpop.trf.xlu1 }
 0x16b   : > { %1291 = vmatprep.mubr.msk.bf16.mxu0 %vm393_vm3, %v385_v36 }
 0x16e   : > { %v386_v37 = vpop.trf.xlu1 }
 0x16f   : > { %1292 = vmatmul.mubr.msk.bf16.vlgmr.msra.gmra.mrb[12].mxu0 %vm393_vm3, %v386_v37 }
 0x172   : > { %v387_v38 = vpop.trf.xlu1 }
 0x173   : > { %1295 = vmatprep.mubr.msk.bf16.mxu0 %vm393_vm3, %v387_v38 }
 0x176   : > { %v388_v39 = vpop.trf.xlu1 }
 0x177   : > { %1296 = vmatmul.mubr.msk.bf16.gmra.mrb[16].mxu0 %vm393_vm3, %v388_v39 }
 0x17a   : > { %v389_v40 = vpop.trf.xlu1 }
 0x17b   : > { %1299 = vmatprep.mubr.msk.bf16.mxu0 %vm393_vm3, %v389_v40 }
 0x17e   : > { %v390_v41 = vpop.trf.xlu1 }
 0x17f   : > { %1300 = vmatmul.mubr.msk.bf16.gmra.mrb[20].mxu0 %vm393_vm3, %v390_v41 }
 0x182   : > { %v391_v42 = vpop.trf.xlu1 }
 0x183   : > { %1303 = vmatprep.mubr.msk.bf16.mxu0 %vm393_vm3, %v391_v42 }
 0x186   : > { %v392_v43 = vpop.trf.xlu1 }
 0x187   : > { %1304 = vmatmul.mubr.msk.bf16.gmra.mrb[24].mxu0 %vm393_vm3, %v392_v43 }
 0x242   : > { %v1293_v59 = vpop.f32.mrb[12].mxu0 }
 0x243   : > { %v456_v60 = vpop.f32.mrb[13].mxu0  ;;  %v896_v2 = vsel %vm1231_vm12, %v1293_v59, -1e+30 }
 0x244   : > { %v1294_v61 = vpop.f32.mrb[14].mxu0  ;;  %v894_v62 = vsel %vm1229_vm11, %v456_v60, -1e+30 }
 0x245   : > { %910 = vmax.xlane.f32.xlu1 %v894_v62  ;;  %v459_v63 = vpop.f32.mrb[15].mxu0  ;;  %v897_v10 = vsel %vm1231_vm12, %v1294_v61, -1e+30 }
 0x246   : > { %v895_v0 = vsel %vm1229_vm11, %v459_v63, -1e+30 }
 0x247   : > { %912 = vmax.xlane.f32.xlu0 %v895_v0 }
 0x24a   : > { %v1297_v1 = vpop.f32.mrb[16].mxu0 }
 0x24b   : > { %914 = vmax.xlane.f32.xlu0 %v896_v2  ;;  %v472_v3 = vpop.f32.mrb[17].mxu0  ;;  %v900_v12 = vsel %vm1235_vm14, %v1297_v1, -1e+30 }
 0x24c   : > { %v898_v4 = vsel %vm1233_vm13, %v472_v3, -1e+30  ;;  %v1298_v6 = vpop.f32.mrb[18].mxu0 }
 0x24d   : > { %918 = vmax.xlane.f32.xlu1 %v898_v4  ;;  %v475_v5 = vpop.f32.mrb[19].mxu0  ;;  %v901_v19 = vsel %vm1235_vm14, %v1298_v6, -1e+30 }
 0x24e   : > { %v899_v13 = vsel %vm1233_vm13, %v475_v5, -1e+30 }
 0x24f   : > { %916 = vmax.xlane.f32.xlu0 %v897_v10 }
 0x251   : > { %922 = vmax.xlane.f32.xlu1 %v900_v12 }
 0x252   : > { %v1301_v14 = vpop.f32.mrb[20].mxu0 }
 0x253   : > { %920 = vmax.xlane.f32.xlu0 %v899_v13  ;;  %v488_v15 = vpop.f32.mrb[21].mxu0  ;;  %v1661_v20 = vsel %vm1239_vm0, %v1301_v14, -1e+30 }
 0x254   : > { %v902_v16 = vsel %vm1237_vm15, %v488_v15, -1e+30  ;;  %v1302_v17 = vpop.f32.mrb[22].mxu0 }
 0x255   : > { %926 = vmax.xlane.f32.xlu1 %v902_v16  ;;  %v491_v18 = vpop.f32.mrb[23].mxu0  ;;  %v1670_v25 = vsel %vm1239_vm0, %v1302_v17, -1e+30 }
 0x256   : > { %v1663_v21 = vsel %vm1237_vm15, %v491_v18, -1e+30 }
 0x257   : > { %924 = vmax.xlane.f32.xlu0 %v901_v19 }
 0x259   : > { %930 = vmax.xlane.f32.xlu1 %v1661_v20 }
 0x25a   : > { %v1305_v22 = vpop.f32.mrb[24].mxu0 }
 0x25b   : > { %928 = vmax.xlane.f32.xlu0 %v1663_v21  ;;  %v504_v23 = vpop.f32.mrb[25].mxu0  ;;  %v1673_v29 = vsel %vm1243_vm2, %v1305_v22, -1e+30 }
 0x25c   : > { %v1667_v24 = vsel %vm1241_vm1, %v504_v23, -1e+30  ;;  %v1306_v26 = vpop.f32.mrb[26].mxu0 }
 0x25d   : > { %934 = vmax.xlane.f32.xlu1 %v1667_v24  ;;  %v507_v27 = vpop.f32.mrb[27].mxu0  ;;  %v1680_v33 = vsel %vm1243_vm2, %v1306_v26, -1e+30 }
 0x25e   : > { %v1676_v31 = vsel %vm1241_vm1, %v507_v27, -1e+30 }
 0x25f   : > { %932 = vmax.xlane.f32.xlu0 %v1670_v25 }
 0x261   : > { %938 = vmax.xlane.f32.xlu1 %v1673_v29 }
 0x263   : > { %936 = vmax.xlane.f32.xlu0 %v1676_v31 }
 0x267   : > { %940 = vmax.xlane.f32.xlu0 %v1680_v33 }
 0x2d2   : > { %v911_v35 = vpop.xlane.xlu1 %910 }
 0x2d3   : > { %v942_v36 = vsub.f32 %v894_v62, %v911_v35 }
 0x2d4   : > { %v913_v37 = vpop.xlane.xlu0 %912 }
 0x2d5   : > { %v958_v38 = vmul.f32 1.442695, %v942_v36  ;;  %v943_v39 = vsub.f32 %v895_v0, %v913_v37 }
 0x2d7   : > { %1378 = vpow2.f32 %v958_v38  ;;  %v960_v40 = vmul.f32 1.442695, %v943_v39 }
 0x2d8   : > { %v915_v41 = vpop.xlane.xlu0 %914 }
 0x2d9   : > { %1380 = vpow2.f32 %v960_v40  ;;  %v944_v42 = vsub.f32 %v896_v2, %v915_v41 }
 0x2da   : > { %v919_v43 = vpop.xlane.xlu1 %918 }
 0x2db   : > { %v962_v44 = vmul.f32 1.442695, %v944_v42  ;;  %v946_v45 = vsub.f32 %v898_v4, %v919_v43  ;;  %v259_v43 = vld [vmem:[%s1831_s3 + $0x10] sm:$0xff] }
 0x2dc   : > { %v917_v46 = vpop.xlane.xlu0 %916 }
 0x2dd   : > { %1382 = vpow2.f32 %v962_v44  ;;  %v966_v47 = vmul.f32 1.442695, %v946_v45  ;;  %v945_v48 = vsub.f32 %v897_v10, %v917_v46  ;;  %v261_v44 = vld [vmem:[%s1831_s3 + $0x20] sm:$0xff]  ;;  %v260_v45 = vld [vmem:[%s1831_s3 + $0x18] sm:$0xff]  ;;  %v262_v46 = vld [vmem:[%s1831_s3 + $0x28] sm:$0xff] }
 0x2de   : > { %v923_v49 = vpop.xlane.xlu1 %922 }
 0x2df   : > { %v964_v50 = vmul.f32 1.442695, %v945_v48  ;;  %v948_v51 = vsub.f32 %v900_v12, %v923_v49  ;;  %1384 = vpow2.f32 %v966_v47 }
 0x2e0   : > { %v921_v52 = vpop.xlane.xlu0 %920 }
 0x2e1   : > { %v1683_v53 = vpop.eup %1378  ;;  %1386 = vpow2.f32 %v964_v50  ;;  %v970_v54 = vmul.f32 1.442695, %v948_v51  ;;  %v947_v55 = vsub.f32 %v899_v13, %v921_v52 }
 0x2e2   : > { %v927_v56 = vpop.xlane.xlu1 %926  ;;  %990 = vadd.xlane.f32.xlu1 %v1683_v53 }
 0x2e3   : > { %v1686_v57 = vpop.eup %1380  ;;  %v968_v58 = vmul.f32 1.442695, %v947_v55  ;;  %v950_v59 = vsub.f32 %v902_v16, %v927_v56  ;;  %1388 = vpow2.f32 %v970_v54 }
 0x2e4   : > { %v925_v60 = vpop.xlane.xlu0 %924  ;;  %992 = vadd.xlane.f32.xlu0 %v1686_v57 }
 0x2e5   : > { %1390 = vpow2.f32 %v968_v58  ;;  %v974_v61 = vmul.f32 1.442695, %v950_v59  ;;  %v949_v62 = vsub.f32 %v901_v19, %v925_v60 }
 0x2e6   : > { %v931_v63 = vpop.xlane.xlu1 %930 }
 0x2e7   : > { %v1689_v0 = vpop.eup %1382  ;;  %v972_v1 = vmul.f32 1.442695, %v949_v62  ;;  %v952_v2 = vsub.f32 %v1661_v20, %v931_v63  ;;  %1392 = vpow2.f32 %v974_v61 }
 0x2e8   : > { %v929_v3 = vpop.xlane.xlu0 %928  ;;  %994 = vadd.xlane.f32.xlu1 %v1689_v0 }
 0x2e9   : > { %1394 = vpow2.f32 %v972_v1  ;;  %v978_v4 = vmul.f32 1.442695, %v952_v2  ;;  %v951_v6 = vsub.f32 %v1663_v21, %v929_v3  ;;  %v1694_v5 = vpop.eup %1384 }
 0x2ea   : > { %v935_v10 = vpop.xlane.xlu1 %934 }
 0x2eb   : > { %v1696_v12 = vpop.eup %1386  ;;  %v976_v13 = vmul.f32 1.442695, %v951_v6  ;;  %1396 = vpow2.f32 %v978_v4  ;;  %v954_v19 = vsub.f32 %v1667_v24, %v935_v10 }
 0x2ec   : > { %v933_v14 = vpop.xlane.xlu0 %932  ;;  %998 = vadd.xlane.f32.xlu1 %v1694_v5  ;;  %996 = vadd.xlane.f32.xlu0 %v1696_v12 }
 0x2ed   : > { %1398 = vpow2.f32 %v976_v13  ;;  %v953_v15 = vsub.f32 %v1670_v25, %v933_v14  ;;  %v1701_v16 = vpop.eup %1388  ;;  %v982_v35 = vmul.f32 1.442695, %v954_v19 }
 0x2ee   : > { %v939_v17 = vpop.xlane.xlu1 %938 }
 0x2ef   : > { %v1703_v18 = vpop.eup %1390  ;;  %v980_v20 = vmul.f32 1.442695, %v953_v15  ;;  %v956_v21 = vsub.f32 %v1673_v29, %v939_v17 }
 0x2f0   : > { %1002 = vadd.xlane.f32.xlu1 %v1701_v16  ;;  %1000 = vadd.xlane.f32.xlu0 %v1703_v18  ;;  %v937_v22 = vpop.xlane.xlu0 %936 }
 0x2f1   : > { %1400 = vpow2.f32 %v980_v20  ;;  %v986_v23 = vmul.f32 1.442695, %v956_v21  ;;  %v955_v26 = vsub.f32 %v1676_v31, %v937_v22  ;;  %v1710_v25 = vpop.eup %1392 }
 0x2f3   : > { %v1712_v27 = vpop.eup %1394  ;;  %1402 = vpow2.f32 %v986_v23  ;;  %v984_v36 = vmul.f32 1.442695, %v955_v26 }
 0x2f4   : > { %1006 = vadd.xlane.f32.xlu1 %v1710_v25  ;;  %1004 = vadd.xlane.f32.xlu0 %v1712_v27  ;;  %v941_v24 = vpop.xlane.xlu0 %940 }
 0x2f5   : > { %1404 = vpow2.f32 %v984_v36  ;;  %v957_v29 = vsub.f32 %v1680_v33, %v941_v24  ;;  %v1717_v37 = vpop.eup %1396 }
 0x2f6   : > { %1406 = vpow2.f32 %v982_v35 }
 0x2f7   : > { %v1719_v38 = vpop.eup %1398  ;;  %v988_v31 = vmul.f32 1.442695, %v957_v29 }
 0x2f8   : > { %1010 = vadd.xlane.f32.xlu1 %v1717_v37  ;;  %1008 = vadd.xlane.f32.xlu0 %v1719_v38 }
 0x2f9   : > { %1408 = vpow2.f32 %v988_v31 }
 0x2fb   : > { %v1723_v39 = vpop.eup %1400 }
 0x2fc   : > { %1012 = vadd.xlane.f32.xlu0 %v1723_v39 }
 0x2fd   : > { %v1726_v40 = vpop.eup %1402 }
 0x2fe   : > { %1018 = vadd.xlane.f32.xlu1 %v1726_v40 }
 0x2ff   : > { %v1729_v33 = vpop.eup %1404 }
 0x300   : > { %1016 = vadd.xlane.f32.xlu0 %v1729_v33  ;;  %v1732_v41 = vpop.eup %1406 }
 0x302   : > { %1014 = vadd.xlane.f32.xlu1 %v1732_v41 }
 0x303   : > { %v1735_v42 = vpop.eup %1408 }
 0x304   : > { %1020 = vadd.xlane.f32.xlu0 %v1735_v42 }
 0x313   : > { %275 = vperm.xlu1 %1374, %v259_v43  }
 0x317   : > { %285 = vperm.xlu1 %1374, %v261_v44  }
 0x31a   : > { %280 = vperm.xlu0 %1373, %v260_v45  }
 0x31b   : > { %290 = vperm.xlu1 %1374, %v262_v46  }
 0x36f   : > { %v991_v47 = vpop.xlane.xlu1 %990 }
 0x370   : > { %1410 = vrcp.f32 %v991_v47 }
 0x371   : > { %v993_v48 = vpop.xlane.xlu0 %992 }
 0x372   : > { %1412 = vrcp.f32 %v993_v48 }
 0x375   : > { %v995_v49 = vpop.xlane.xlu1 %994 }
 0x376   : > { %1414 = vrcp.f32 %v995_v49 }
 0x379   : > { %v999_v50 = vpop.xlane.xlu1 %998  ;;  %v997_v51 = vpop.xlane.xlu0 %996 }
 0x37a   : > { %v1411_v52 = vpop.eup %1410  ;;  %1416 = vrcp.f32 %v997_v51 }
 0x37b   : > { %1418 = vrcp.f32 %v999_v50  ;;  %v1038_v58 = vmul.f32 %v1411_v52, %v1683_v53 }
 0x37c   : > { %v1413_v54 = vpop.eup %1412 }
 0x37d   : > { %v1003_v55 = vpop.xlane.xlu1 %1002  ;;  %v1001_v56 = vpop.xlane.xlu0 %1000  ;;  %v1039_v59 = vmul.f32 %v1413_v54, %v1686_v57 }
 0x37e   : > { %1420 = vrcp.f32 %v1001_v56 }
 0x37f   : > { %v1056_v60 = vpack.c.bf16 %v1039_v59, %v1038_v58  ;;  %1422 = vrcp.f32 %v1003_v55 }
 0x380   : > { %v1415_v63 = vpop.eup %1414 }
 0x381   : > { %v1007_v61 = vpop.xlane.xlu1 %1006  ;;  %1307 = vmatprep.subr.bf16.mxu1 %v1056_v60  ;;  %v1005_v62 = vpop.xlane.xlu0 %1004  ;;  %v1040_v3 = vmul.f32 %v1415_v63, %v1689_v0 }
 0x382   : > { %1308 = vmatpush3.bf16.xpose.msra.mxu1 %v1056_v60  ;;  %1424 = vrcp.f32 %v1005_v62 }
 0x384   : > { %v1417_v1 = vpop.eup %1416 }
 0x385   : > { %v1009_v2 = vpop.xlane.xlu0 %1008  ;;  %v1041_v4 = vmul.f32 %v1417_v1, %v1696_v12  ;;  %v1419_v6 = vpop.eup %1418 }
 0x386   : > { %v1011_v10 = vpop.xlane.xlu1 %1010  ;;  %1426 = vrcp.f32 %v1009_v2  ;;  %v1042_v14 = vmul.f32 %v1419_v6, %v1694_v5 }
 0x387   : > { %v1057_v53 = vpack.c.bf16 %v1041_v4, %v1040_v3  ;;  %1428 = vrcp.f32 %v1007_v61 }
 0x388   : > { %v1421_v13 = vpop.eup %1420 }
 0x389   : > { %v1013_v57 = vpop.xlane.xlu0 %1012  ;;  %1309 = vmatprep.subr.bf16.mxu1 %v1057_v53  ;;  %v1043_v15 = vmul.f32 %v1421_v13, %v1703_v18  ;;  %v1423_v19 = vpop.eup %1422 }
 0x38a   : > { %1310 = vmatpush3.bf16.xpose.msra.mxu1 %v1057_v53  ;;  %v1044_v23 = vmul.f32 %v1423_v19, %v1701_v16  ;;  %1430 = vrcp.f32 %v1013_v57 }
 0x38b   : > { %v1019_v17 = vpop.xlane.xlu1 %1018  ;;  %v1058_v20 = vpack.c.bf16 %v1043_v15, %v1042_v14  ;;  %1432 = vrcp.f32 %v1011_v10 }
 0x38c   : > { %v1425_v21 = vpop.eup %1424 }
 0x38d   : > { %1311 = vmatprep.subr.bf16.mxu1 %v1058_v20  ;;  %v1045_v0 = vmul.f32 %v1425_v21, %v1712_v27  ;;  %v1017_v12 = vpop.xlane.xlu0 %1016 }
 0x38f   : > { %v1015_v22 = vpop.xlane.xlu1 %1014  ;;  %v1059_v26 = vpack.c.bf16 %v1045_v0, %v1044_v23 }
 0x390   : > { %v1427_v35 = vpop.eup %1426  ;;  %1434 = vrcp.f32 %v1015_v22 }
 0x391   : > { %v1429_v18 = vpop.eup %1428  ;;  %v1021_v36 = vpop.xlane.xlu0 %1020  ;;  %v1047_v24 = vmul.f32 %v1427_v35, %v1719_v38  ;;  %1436 = vrcp.f32 %v1017_v12 }
 0x392   : > { %1312 = vmatpush3.bf16.xpose.msra.mxu1 %v1058_v20  ;;  %v1046_v31 = vmul.f32 %v1429_v18, %v1710_v25  ;;  %1438 = vrcp.f32 %v1021_v36 }
 0x393   : > { %v276_v5 = vpop.permute.xlu1 %275  ;;  %1313 = vmatprep.subr.bf16.mxu1 %v1059_v26  ;;  %1440 = vrcp.f32 %v1019_v17 }
 0x394   : > { %v361_v43 = vadd.f32 %v1635_v28, %v276_v5  ;;  %v1060_v44 = vpack.c.bf16 %v1047_v24, %v1046_v31  ;;  %v1431_v45 = vpop.eup %1430 }
 0x395   : > { %v1433_v49 = vpop.eup %1432  ;;  %v1049_v25 = vmul.f32 %v1431_v45, %v1723_v39 }
 0x396   : > { %v1048_v28 = vmul.f32 %v1433_v49, %v1717_v37 }
 0x397   : > { %v286_v29 = vpop.permute.xlu1 %285 }
 0x398   : > { %v369_v47 = vadd.f32 %v1639_v32, %v286_v29 }
 0x399   : > { %v281_v27 = vpop.permute.xlu0 %280 }
 0x39a   : > { %v364_v16 = vadd.f32 %v1637_v30, %v281_v27  ;;  %1314 = vmatpush3.bf16.xpose.msra.mxu1 %v1059_v26  ;;  %v1061_v30 = vpack.c.bf16 %v1049_v25, %v1048_v28  ;;  %v1435_v51 = vpop.eup %1434 }
 0x39b   : > { %v291_v46 = vpop.permute.xlu1 %290  ;;  %1315 = vmatprep.subr.bf16.mxu1 %v1060_v44  ;;  %v1437_v52 = vpop.eup %1436  ;;  %v1050_v32 = vmul.f32 %v1435_v51, %v1732_v41  ;;  %v1113_v41 = vstv %s244_s14 }
 0x39c   : > { %v372_v48 = vadd.f32 %v1641_v34, %v291_v46  ;;  %v1054_v38 = vpack.c.bf16 %v364_v16, %v361_v43  ;;  %v1051_v34 = vmul.f32 %v1437_v52, %v1729_v33  ;;  %v1439_v55 = vpop.eup %1438 }
 0x39d   : > { %v1441_v56 = vpop.eup %1440  ;;  %v1053_v39 = vmul.f32 %v1439_v55, %v1735_v42 }
 0x39e   : > { %v1055_v50 = vpack.c.bf16 %v372_v48, %v369_v47  ;;  %1323 = vmatprep.mubr.bf16.mxu1 %v1054_v38  ;;  %v1062_v54 = vpack.c.bf16 %v1051_v34, %v1050_v32  ;;  %v1052_v37 = vmul.f32 %v1441_v56, %v1726_v40 }
 0x3a0   : > { %v1063_v58 = vpack.c.bf16 %v1053_v39, %v1052_v37 }
 0x3a2   : > { %1316 = vmatpush3.bf16.xpose.msra.mxu1 %v1060_v44 }
 0x3a3   : > { %1317 = vmatprep.subr.bf16.mxu1 %v1061_v30 }
 0x3aa   : > { %1318 = vmatpush3.bf16.xpose.msra.mxu1 %v1061_v30 }
 0x3ab   : > { %1319 = vmatprep.subr.bf16.mxu1 %v1062_v54 }
 0x3b2   : > { %1320 = vmatpush3.bf16.xpose.msra.mxu1 %v1062_v54 }
 0x3b3   : > { %1321 = vmatprep.subr.bf16.mxu1 %v1063_v58 }
 0x3ba   : > { %1322 = vmatpush3.bf16.xpose.msra.mxu1 %v1063_v58 }
 0x3c1   : > { %1324 = vmatmul.mubr.bf16.vlgmr.msra.gmra.mrb[0].mxu1 %v1055_v50 }
 0x494   : > { %v1325_v59 = vpop.f32.mrb[0].mxu1 }
 0x495   : > { %v1116_v33 = vmul.f32 %v1325_v59, %v1113_v41  ;;  %v1098_v60 = vpop.f32.mrb[1].mxu1 }
 0x496   : > { %v1114_v61 = vmul.f32 %v1113_v41, %v1098_v60  ;;  %v1326_v62 = vpop.f32.mrb[2].mxu1 }
 0x497   : > { %v1120_v42 = vadd.f32 %v1116_v33, %v1612_v9  ;;  %v1117_v40 = vmul.f32 %v1326_v62, %v1113_v41  ;;  %v1101_v63 = vpop.f32.mrb[3].mxu1 }
 0x498   : > { %v1118_v1 = vadd.f32 %v1114_v61, %v1608_v7  ;;  %v1115_v2 = vmul.f32 %v1113_v41, %v1101_v63 }
 0x499   : > { %1124 = vst [vmem:[%s242_s15 + $0x10] sm:$0xff] %v1120_v42  ;;  %v1121_v3 = vadd.f32 %v1117_v40, %v1616_v11 }
 0x49a   : > { %1122 = vst [vmem:[%s242_s15] sm:$0xff] %v1118_v1  ;;  %v1119_v9 = vadd.f32 %v1115_v2, %v1610_v8 }
 0x49b   : > { %1125 = vst [vmem:[%s242_s15 + $0x18] sm:$0xff] %v1121_v3 }
 0x49c   : > { %1123 = vst [vmem:[%s242_s15 + $0x8] sm:$0xff] %v1119_v9 }
 0x49d   : > { %1455 = shalt.err (!%p1452_p5)
}
 0x49e   : > { %s1456_s9 = scalar_lea.hbm %s1781_s0, 512  ;;  %s1460_s8 = scalar_lea.hbm %s1832_s4, 1024 }
 0x49f   : > { %p1457_p7 = scmp.ne.s32.totalorder %s1781_s0, %s1456_s9  ;;  %p1461_p12 = scmp.lt.u32.totalorder %s1781_s0, %s1832_s4 }
 0x4a0   : > { %p1462_p13 = scmp.lt.u32.totalorder %s1460_s8, %s1456_s9  ;;  %p1464_p1 = scmp.lt.u32.totalorder %s1456_s9, %s1781_s0 }
 0x4a1   : > { %p1458_p10 = pnand %p1457_p7, %p1579_p6 }
 0x4a2   : > { %p1463_p0 = por %p1462_p13, %p1461_p12 }
 0x4a3   : > { %p1459_p11 = pneg %p1458_p10 }
 0x4a4   : > { %p1465_p2 = por %p1464_p1, %p1463_p0 }
 0x4a6   : > { %p1466_p3 = pnand %p1465_p2, %p1459_p11 }
 0x4a8   : > { %1469 = shalt.err (!%p1466_p3)
}
 0x4a9   : > { %s1510_s13 = smov 128   ;;  %s1511_s14 = smov 256  }
 0x4aa   : > { %s1512_s15 = smov 8  }
 0x4ab   : > { %1328 = dma.vmem_to_hbm [thread:$0]  (%p1579_p6), %s1774_s16, 512, %s1781_s0, %s1786_s24, %s1510_s13, %s1511_s14, %s1512_s15  }
 0x4ac PF: > { %s1154_s21 = sand.u32 1, %s1492_s17   ;;  %p1331_p4 = pnand %p1209_p9, %p1583_p8 }
 0x4ad   : > { %s1155_s10 = scalar_lea.sflag [#allocation5], %s1154_s21 }
 0x4ae   : > { %1487 = dma.done.wait (!%p1331_p4), %s1155_s10, 512  }
 0x4af   : > { %1489 = vsyncadd (!%p1331_p4), %s1155_s10, 4294966784  ;;  %p15_p5 = scmp.ge.s32.totalorder %s1564_s22, 4   ;;  %s1835_s17 = smov %s1496_s18 }
 0x4b0   : > { %s1836_s18 = smov %s1500_s19  ;;  %s1837_s19 = smov %s1577_s25 }
 0x4b1   : > { %s1838_s20 = smov %s1564_s22  ;;  %17 = sbr.rel (!%p15_p5) target bundleno = 5 (0x5), region = 114 }
 0x4b8   :  { %1160 = vsyncpa [#allocation5], 1 }
 0x4b9   :  { %1162 = vsyncpa [#allocation5 + $0x1], 1 }

</bundles_post_ra>
